<compile_context>
chip_gen: v6e
topology: v6e:2x2x1
jax: 0.10.0
libtpu: 0.0.40
codegen_flags: <defaults>
</compile_context>

<pallas_src>
import functools
import math

import jax
import jax.numpy as jnp
from jax.experimental import pallas as pl
from jax.experimental.pallas import tpu as pltpu


_S4_PARAM_NAMES = ("ln_g", "ln_b", "Tk", "Wo_a", "Wo_b", "bo_a", "bo_b")
_FF_PARAM_NAMES = ("ln_g", "ln_b", "W1", "b1", "W2", "b2")
_HEAD_PARAM_NAMES = ("lnf_g", "lnf_b", "Wout", "bout")


# ----------------------------------------------------------------------------
# Fused full-model kernel (one batch row per grid step)
# ----------------------------------------------------------------------------

def _layer_norm(h, g_ref, b_ref):
    # f32 statistics on the VPU; gamma/beta are (1, D) and broadcast over rows.
    mu = jnp.mean(h, axis=-1, keepdims=True)
    var = jnp.mean((h - mu) ** 2, axis=-1, keepdims=True)
    return (h - mu) * jax.lax.rsqrt(var + 1e-5) * g_ref[...] + b_ref[...]


def _make_model_kernel(block_types):
    """Builds a kernel closing over the (static) block sequence.

    Ref order: x, then per-block params in block order, then head params, then the output.
    """

    def kernel(*refs):
        o_ref = refs[-1]
        it = iter(refs[:-1])

        x_ref = next(it)
        h = x_ref[...].astype(jnp.float32)[0]                       # (L, D), channel-last

        for bt in block_types:
            if bt == "s4":
                g, b, tk, woa, wob, boa, bob = (next(it) for _ in range(7))
                z = _layer_norm(h, g, b)
                # per-channel causal SSM conv (depthwise Toeplitz), D stays on lanes:
                #   y[t, d] = sum_s z[s, d] * Tk[s, t, d]
                y = jnp.sum(z[:, None, :] * tk[...], axis=0)        # (L, D)
                y = jax.nn.gelu(y, approximate=True)
                # GLU output linear: two lane-dense dots, bf16 operands / f32 accumulate.
                yb = y.astype(jnp.bfloat16)
                a = jnp.dot(yb, woa[...], preferred_element_type=jnp.float32) + boa[...]
                gate = jnp.dot(yb, wob[...], preferred_element_type=jnp.float32) + bob[...]
                h = h + a * jax.nn.sigmoid(gate)                    # residual (dropout = eval no-op)
            else:  # ff
                g, b, w1, b1, w2, b2 = (next(it) for _ in range(6))
                z = _layer_norm(h, g, b)
                t = jnp.dot(z.astype(jnp.bfloat16), w1[...],
                            preferred_element_type=jnp.float32) + b1[...]
                t = jax.nn.gelu(t, approximate=True)
                t = jnp.dot(t.astype(jnp.bfloat16), w2[...],
                            preferred_element_type=jnp.float32) + b2[...]
                h = h + t                                           # residual

        # Final LayerNorm + output embedding Linear (head) — fused, only HBM write of the kernel.
        lg, lb, wout, bout = (next(it) for _ in range(4))
        z = _layer_norm(h, lg, lb)
        logits = jnp.dot(z.astype(jnp.bfloat16), wout[...],
                         preferred_element_type=jnp.float32) + bout[...]
        o_ref[...] = logits[None].astype(o_ref.dtype)

    return kernel


def fused_forward(params, x, *, block_types):
    """x: (B, L, D) channel-last embeddings -> logits (B, L, V), one pallas_call."""
    B, L, D = x.shape
    V = params["Wout"].shape[1]

    def const_spec(arr):
        nd = arr.ndim
        return pl.BlockSpec(arr.shape, lambda b, _nd=nd: (0,) * _nd)

    args = [x]
    in_specs = [pl.BlockSpec((1, L, D), lambda b: (b, 0, 0))]
    for bt, blk in zip(block_types, params["blocks"]):
        names = _S4_PARAM_NAMES if bt == "s4" else _FF_PARAM_NAMES
        for n in names:
            args.append(blk[n])
            in_specs.append(const_spec(blk[n]))
    for n in _HEAD_PARAM_NAMES:
        args.append(params[n])
        in_specs.append(const_spec(params[n]))

    return pl.pallas_call(
        _make_model_kernel(block_types),
        out_shape=jax.ShapeDtypeStruct((B, L, V), x.dtype),
        grid=(B,),
        in_specs=in_specs,
        out_specs=pl.BlockSpec((1, L, V), lambda b: (b, 0, 0)),
        compiler_params=pltpu.CompilerParams(
            dimension_semantics=("parallel",)),
    )(*args)


# ----------------------------------------------------------------------------
# Parameter setup (deterministic, in-script) — plain JAX glue
# ----------------------------------------------------------------------------

def _s4d_toeplitz_channels_last(log_dt, c_re, c_im, d_skip, L):
    """Causal Toeplitz operator from diagonal-SSM (S4D/ZOH) params, channel-last: Tk[s, t, d]."""
    D, N2 = c_re.shape
    dt = jnp.exp(log_dt)[:, None]                               # (D, 1)
    a = (-0.5 + 1j * math.pi * jnp.arange(N2))[None, :]         # S4D-Lin init, (1, N2)
    a = jnp.broadcast_to(a, (D, N2))
    c = c_re + 1j * c_im
    dt_a = dt * a                                               # (D, N2)
    d_b = (jnp.exp(dt_a) - 1.0) / a                             # ZOH discretization, B = 1
    ell = jnp.arange(L)
    vand = jnp.exp(dt_a[:, :, None] * ell[None, None, :])       # (D, N2, L)
    k = 2.0 * jnp.real(jnp.einsum("dn,dnl->dl", c * d_b, vand))   # (D, L) real conv kernel
    t_idx = jnp.arange(L)[None, :]
    s_idx = jnp.arange(L)[:, None]
    diff = t_idx - s_idx
    gathered = k[:, jnp.maximum(diff, 0)]                       # (D, L, L)
    toe = jnp.where((diff >= 0)[None, :, :], gathered, 0.0)
    toe = toe + d_skip[:, None, None] * jnp.eye(L)[None, :, :]  # D-skip on the diagonal
    # Channel-last (lane-dense on D) so the in-kernel conv never transposes activations.
    return jnp.transpose(toe, (1, 2, 0)).astype(jnp.float32)    # (L_s, L_t, D)


def init_params(key, *, vocab_size, model_dim, state_dim, n_layers, seq_len):
    D, N, V, L = model_dim, state_dim, vocab_size, seq_len
    keys = iter(jax.random.split(key, 128))
    nrm = lambda k, s, sc, dt=jnp.float32: (sc * jax.random.normal(k, s)).astype(dt)

    params = {
        "emb": nrm(next(keys), (V, D), 0.02),
        "lnf_g": jnp.ones((1, D), jnp.float32),
        "lnf_b": jnp.zeros((1, D), jnp.float32),
        "Wout": nrm(next(keys), (D, V), 1.0 / math.sqrt(D), jnp.bfloat16),
        "bout": jnp.zeros((1, V), jnp.float32),
        "blocks": [],
    }
    block_types = []
    for _ in range(n_layers):
        for name in ("s4", "s4", "ff"):
            block_types.append(name)
            if name == "s4":
                log_dt = jnp.log(
                    10.0 ** jax.random.uniform(next(keys), (D,), minval=-3.0, maxval=-1.0)
                ).astype(jnp.float32)
                c_re = nrm(next(keys), (D, N // 2), 0.5)
                c_im = nrm(next(keys), (D, N // 2), 0.5)
                d_skip = nrm(next(keys), (D,), 1.0)
                blk = {
                    "ln_g": jnp.ones((1, D), jnp.float32),
                    "ln_b": jnp.zeros((1, D), jnp.float32),
                    "Tk": _s4d_toeplitz_channels_last(log_dt, c_re, c_im, d_skip, L),
                    # GLU output linear stored as two lane-dense (D, D) halves.
                    "Wo_a": nrm(next(keys), (D, D), 1.0 / math.sqrt(D), jnp.bfloat16),
                    "Wo_b": nrm(next(keys), (D, D), 1.0 / math.sqrt(D), jnp.bfloat16),
                    "bo_a": jnp.zeros((1, D), jnp.float32),
                    "bo_b": jnp.zeros((1, D), jnp.float32),
                }
            else:  # ff (expand=2, GELU)
                blk = {
                    "ln_g": jnp.ones((1, D), jnp.float32),
                    "ln_b": jnp.zeros((1, D), jnp.float32),
                    "W1": nrm(next(keys), (D, 2 * D), 1.0 / math.sqrt(D), jnp.bfloat16),
                    "b1": jnp.zeros((1, 2 * D), jnp.float32),
                    "W2": nrm(next(keys), (2 * D, D), 1.0 / math.sqrt(2 * D), jnp.bfloat16),
                    "b2": jnp.zeros((1, D), jnp.float32),
                }
            params["blocks"].append(blk)
    return params, tuple(block_types)


# ----------------------------------------------------------------------------
# Forward pass
# ----------------------------------------------------------------------------

def forward(params, tokens, *, block_types, model_dim, seq_len, vocab_size):
    B = tokens.shape[0]
    tok = tokens.reshape(B, seq_len)

    # Embedding lookup (data-dependent gather) kept in plain JAX glue.
    x = jnp.take(params["emb"], tok, axis=0)                    # (B, L, D), channel-last

    # Entire residual stack + final LN + output Linear in one fused pallas_call.
    return fused_forward(params, x, block_types=block_types)


# ----------------------------------------------------------------------------
# Main
# ----------------------------------------------------------------------------

if __name__ == "__main__":
    # Small config consistent with the module's constructor arguments.
    model_dim = 32
    state_dim = 8
    n_layers = 1
    n_heads = 4          # TODO(synk): head grouping of the repo's S4 layer not replicated
    dropout = 0.0
    sequence_length = 16
    vocab_size = 16
    batch_size = 2

    key = jax.random.PRNGKey(0)
    k_tok, k_param = jax.random.split(key)

    params, block_types = init_params(
        k_param,
        vocab_size=vocab_size,
        model_dim=model_dim,
        state_dim=state_dim,
        n_layers=n_layers,
        seq_len=sequence_length,
    )

    # Input tokens: (batch_size, sequence_length, 1), as per the PyTorch docstring.
    tokens = jax.random.randint(
        k_tok, (batch_size, sequence_length, 1), 0, vocab_size, dtype=jnp.int32
    )

    fwd = jax.jit(functools.partial(
        forward,
        block_types=block_types,
        model_dim=model_dim,
        seq_len=sequence_length,
        vocab_size=vocab_size,
    ))
    logits = jax.block_until_ready(fwd(params, tokens))

    assert logits.shape == (batch_size, sequence_length, vocab_size)
    assert bool(jnp.all(jnp.isfinite(logits)))
    print("KERNEL_OK")
</pallas_src>

<mosaic_0001>
module attributes {stable_mosaic.version = 11 : i64} {
  func.func @kernel(%arg0: i32, %arg1: memref<1x16x32xf32, #tpu.memory_space<vmem>>, %arg2: memref<1x32xf32, #tpu.memory_space<vmem>>, %arg3: memref<1x32xf32, #tpu.memory_space<vmem>>, %arg4: memref<16x16x32xf32, #tpu.memory_space<vmem>>, %arg5: memref<32x32xbf16, #tpu.memory_space<vmem>>, %arg6: memref<32x32xbf16, #tpu.memory_space<vmem>>, %arg7: memref<1x32xf32, #tpu.memory_space<vmem>>, %arg8: memref<1x32xf32, #tpu.memory_space<vmem>>, %arg9: memref<1x32xf32, #tpu.memory_space<vmem>>, %arg10: memref<1x32xf32, #tpu.memory_space<vmem>>, %arg11: memref<16x16x32xf32, #tpu.memory_space<vmem>>, %arg12: memref<32x32xbf16, #tpu.memory_space<vmem>>, %arg13: memref<32x32xbf16, #tpu.memory_space<vmem>>, %arg14: memref<1x32xf32, #tpu.memory_space<vmem>>, %arg15: memref<1x32xf32, #tpu.memory_space<vmem>>, %arg16: memref<1x32xf32, #tpu.memory_space<vmem>>, %arg17: memref<1x32xf32, #tpu.memory_space<vmem>>, %arg18: memref<32x64xbf16, #tpu.memory_space<vmem>>, %arg19: memref<1x64xf32, #tpu.memory_space<vmem>>, %arg20: memref<64x32xbf16, #tpu.memory_space<vmem>>, %arg21: memref<1x32xf32, #tpu.memory_space<vmem>>, %arg22: memref<1x32xf32, #tpu.memory_space<vmem>>, %arg23: memref<1x32xf32, #tpu.memory_space<vmem>>, %arg24: memref<32x16xbf16, #tpu.memory_space<vmem>>, %arg25: memref<1x16xf32, #tpu.memory_space<vmem>>, %arg26: memref<1x16x16xf32, #tpu.memory_space<vmem>>) attributes {dimension_semantics = [#tpu.dimension_semantics<parallel>], iteration_bounds = array<i64: 2>, scalar_prefetch = 0 : i64, scratch_operands = 0 : i64, tpu.core_type = #tpu.core_type<tc>, window_params = [{transform_indices = @transform_0, window_bounds = array<i64: 1, 16, 32>}, {pipeline_mode = #tpu.pipeline_mode<synchronous>, transform_indices = @transform_1, window_bounds = array<i64: 1, 32>}, {pipeline_mode = #tpu.pipeline_mode<synchronous>, transform_indices = @transform_2, window_bounds = array<i64: 1, 32>}, {pipeline_mode = #tpu.pipeline_mode<synchronous>, transform_indices = @transform_3, window_bounds = array<i64: 16, 16, 32>}, {pipeline_mode = #tpu.pipeline_mode<synchronous>, transform_indices = @transform_4, window_bounds = array<i64: 32, 32>}, {pipeline_mode = #tpu.pipeline_mode<synchronous>, transform_indices = @transform_5, window_bounds = array<i64: 32, 32>}, {pipeline_mode = #tpu.pipeline_mode<synchronous>, transform_indices = @transform_6, window_bounds = array<i64: 1, 32>}, {pipeline_mode = #tpu.pipeline_mode<synchronous>, transform_indices = @transform_7, window_bounds = array<i64: 1, 32>}, {pipeline_mode = #tpu.pipeline_mode<synchronous>, transform_indices = @transform_8, window_bounds = array<i64: 1, 32>}, {pipeline_mode = #tpu.pipeline_mode<synchronous>, transform_indices = @transform_9, window_bounds = array<i64: 1, 32>}, {pipeline_mode = #tpu.pipeline_mode<synchronous>, transform_indices = @transform_10, window_bounds = array<i64: 16, 16, 32>}, {pipeline_mode = #tpu.pipeline_mode<synchronous>, transform_indices = @transform_11, window_bounds = array<i64: 32, 32>}, {pipeline_mode = #tpu.pipeline_mode<synchronous>, transform_indices = @transform_12, window_bounds = array<i64: 32, 32>}, {pipeline_mode = #tpu.pipeline_mode<synchronous>, transform_indices = @transform_13, window_bounds = array<i64: 1, 32>}, {pipeline_mode = #tpu.pipeline_mode<synchronous>, transform_indices = @transform_14, window_bounds = array<i64: 1, 32>}, {pipeline_mode = #tpu.pipeline_mode<synchronous>, transform_indices = @transform_15, window_bounds = array<i64: 1, 32>}, {pipeline_mode = #tpu.pipeline_mode<synchronous>, transform_indices = @transform_16, window_bounds = array<i64: 1, 32>}, {pipeline_mode = #tpu.pipeline_mode<synchronous>, transform_indices = @transform_17, window_bounds = array<i64: 32, 64>}, {pipeline_mode = #tpu.pipeline_mode<synchronous>, transform_indices = @transform_18, window_bounds = array<i64: 1, 64>}, {pipeline_mode = #tpu.pipeline_mode<synchronous>, transform_indices = @transform_19, window_bounds = array<i64: 64, 32>}, {pipeline_mode = #tpu.pipeline_mode<synchronous>, transform_indices = @transform_20, window_bounds = array<i64: 1, 32>}, {pipeline_mode = #tpu.pipeline_mode<synchronous>, transform_indices = @transform_21, window_bounds = array<i64: 1, 32>}, {pipeline_mode = #tpu.pipeline_mode<synchronous>, transform_indices = @transform_22, window_bounds = array<i64: 1, 32>}, {pipeline_mode = #tpu.pipeline_mode<synchronous>, transform_indices = @transform_23, window_bounds = array<i64: 32, 16>}, {pipeline_mode = #tpu.pipeline_mode<synchronous>, transform_indices = @transform_24, window_bounds = array<i64: 1, 16>}, {transform_indices = @transform_25, window_bounds = array<i64: 1, 16, 16>}]} {
    %c0 = arith.constant 0 : index
    %c0_0 = arith.constant 0 : index
    %c0_1 = arith.constant 0 : index
    %0 = vector.load %arg1[%c0, %c0_0, %c0_1] : memref<1x16x32xf32, #tpu.memory_space<vmem>>, vector<1x16x32xf32>
    %1 = vector.shape_cast %0 : vector<1x16x32xf32> to vector<16x32xf32>
    %cst = arith.constant dense<0.000000e+00> : vector<16xf32>
    %2 = vector.multi_reduction <add>, %1, %cst [1] : vector<16x32xf32> to vector<16xf32>
    %3 = vector.shape_cast %2 : vector<16xf32> to vector<16x1xf32>
    %cst_2 = arith.constant 3.200000e+01 : f32
    %4 = vector.broadcast %cst_2 : f32 to vector<16x1xf32>
    %5 = arith.divf %3, %4 : vector<16x1xf32>
    %6 = vector.broadcast %5 : vector<16x1xf32> to vector<16x32xf32>
    %7 = arith.subf %1, %6 : vector<16x32xf32>
    %8 = arith.mulf %7, %7 : vector<16x32xf32>
    %cst_3 = arith.constant dense<0.000000e+00> : vector<16xf32>
    %9 = vector.multi_reduction <add>, %8, %cst_3 [1] : vector<16x32xf32> to vector<16xf32>
    %10 = vector.shape_cast %9 : vector<16xf32> to vector<16x1xf32>
    %cst_4 = arith.constant 3.200000e+01 : f32
    %11 = vector.broadcast %cst_4 : f32 to vector<16x1xf32>
    %12 = arith.divf %10, %11 : vector<16x1xf32>
    %13 = vector.broadcast %5 : vector<16x1xf32> to vector<16x32xf32>
    %14 = arith.subf %1, %13 : vector<16x32xf32>
    %cst_5 = arith.constant 9.99999974E-6 : f32
    %15 = vector.broadcast %cst_5 : f32 to vector<16x1xf32>
    %16 = arith.addf %12, %15 : vector<16x1xf32>
    %17 = math.rsqrt %16 : vector<16x1xf32>
    %18 = vector.broadcast %17 : vector<16x1xf32> to vector<16x32xf32>
    %19 = arith.mulf %14, %18 : vector<16x32xf32>
    %c0_6 = arith.constant 0 : index
    %c0_7 = arith.constant 0 : index
    %20 = vector.load %arg2[%c0_6, %c0_7] : memref<1x32xf32, #tpu.memory_space<vmem>>, vector<1x32xf32>
    %21 = vector.broadcast %20 : vector<1x32xf32> to vector<16x32xf32>
    %22 = arith.mulf %19, %21 : vector<16x32xf32>
    %c0_8 = arith.constant 0 : index
    %c0_9 = arith.constant 0 : index
    %23 = vector.load %arg3[%c0_8, %c0_9] : memref<1x32xf32, #tpu.memory_space<vmem>>, vector<1x32xf32>
    %24 = vector.broadcast %23 : vector<1x32xf32> to vector<16x32xf32>
    %25 = arith.addf %22, %24 : vector<16x32xf32>
    %26 = vector.shape_cast %25 : vector<16x32xf32> to vector<16x1x32xf32>
    %c0_10 = arith.constant 0 : index
    %c0_11 = arith.constant 0 : index
    %c0_12 = arith.constant 0 : index
    %27 = vector.load %arg4[%c0_10, %c0_11, %c0_12] : memref<16x16x32xf32, #tpu.memory_space<vmem>>, vector<16x16x32xf32>
    %28 = vector.broadcast %26 : vector<16x1x32xf32> to vector<16x16x32xf32>
    %29 = arith.mulf %28, %27 : vector<16x16x32xf32>
    %cst_13 = arith.constant dense<0.000000e+00> : vector<16x32xf32>
    %30 = vector.multi_reduction <add>, %29, %cst_13 [0] : vector<16x16x32xf32> to vector<16x32xf32>
    %31 = arith.mulf %30, %30 : vector<16x32xf32>
    %32 = arith.mulf %30, %31 : vector<16x32xf32>
    %cst_14 = arith.constant 4.471500e-02 : f32
    %33 = vector.broadcast %cst_14 : f32 to vector<16x32xf32>
    %34 = arith.mulf %33, %32 : vector<16x32xf32>
    %35 = arith.addf %30, %34 : vector<16x32xf32>
    %cst_15 = arith.constant 0.797884583 : f32
    %36 = vector.broadcast %cst_15 : f32 to vector<16x32xf32>
    %37 = arith.mulf %36, %35 : vector<16x32xf32>
    %38 = math.tanh %37 : vector<16x32xf32>
    %cst_16 = arith.constant 1.000000e+00 : f32
    %39 = vector.broadcast %cst_16 : f32 to vector<16x32xf32>
    %40 = arith.addf %39, %38 : vector<16x32xf32>
    %cst_17 = arith.constant 5.000000e-01 : f32
    %41 = vector.broadcast %cst_17 : f32 to vector<16x32xf32>
    %42 = arith.mulf %41, %40 : vector<16x32xf32>
    %43 = arith.mulf %30, %42 : vector<16x32xf32>
    %44 = arith.truncf %43 : vector<16x32xf32> to vector<16x32xbf16>
    %c0_18 = arith.constant 0 : index
    %c0_19 = arith.constant 0 : index
    %45 = vector.load %arg5[%c0_18, %c0_19] : memref<32x32xbf16, #tpu.memory_space<vmem>>, vector<32x32xbf16>
    %cst_20 = arith.constant dense<0.000000e+00> : vector<16x32xf32>
    %46 = tpu.matmul %44, %45, %cst_20 {dimension_numbers = #tpu.dot_dimension_numbers<[1], [0], [0], [1], [0, 0, 1, 1], [], []>} : vector<16x32xbf16>, vector<32x32xbf16>, vector<16x32xf32> -> vector<16x32xf32>
    %c0_21 = arith.constant 0 : index
    %c0_22 = arith.constant 0 : index
    %47 = vector.load %arg7[%c0_21, %c0_22] : memref<1x32xf32, #tpu.memory_space<vmem>>, vector<1x32xf32>
    %48 = vector.broadcast %47 : vector<1x32xf32> to vector<16x32xf32>
    %49 = arith.addf %46, %48 : vector<16x32xf32>
    %c0_23 = arith.constant 0 : index
    %c0_24 = arith.constant 0 : index
    %50 = vector.load %arg6[%c0_23, %c0_24] : memref<32x32xbf16, #tpu.memory_space<vmem>>, vector<32x32xbf16>
    %cst_25 = arith.constant dense<0.000000e+00> : vector<16x32xf32>
    %51 = tpu.matmul %44, %50, %cst_25 {dimension_numbers = #tpu.dot_dimension_numbers<[1], [0], [0], [1], [0, 0, 1, 1], [], []>} : vector<16x32xbf16>, vector<32x32xbf16>, vector<16x32xf32> -> vector<16x32xf32>
    %c0_26 = arith.constant 0 : index
    %c0_27 = arith.constant 0 : index
    %52 = vector.load %arg8[%c0_26, %c0_27] : memref<1x32xf32, #tpu.memory_space<vmem>>, vector<1x32xf32>
    %53 = vector.broadcast %52 : vector<1x32xf32> to vector<16x32xf32>
    %54 = arith.addf %51, %53 : vector<16x32xf32>
    %55 = arith.negf %54 : vector<16x32xf32>
    %56 = math.exp %55 : vector<16x32xf32>
    %cst_28 = arith.constant 1.000000e+00 : f32
    %57 = vector.broadcast %cst_28 : f32 to vector<16x32xf32>
    %58 = arith.addf %57, %56 : vector<16x32xf32>
    %59 = arith.divf %57, %58 : vector<16x32xf32>
    %60 = arith.mulf %49, %59 : vector<16x32xf32>
    %61 = arith.addf %1, %60 : vector<16x32xf32>
    %cst_29 = arith.constant dense<0.000000e+00> : vector<16xf32>
    %62 = vector.multi_reduction <add>, %61, %cst_29 [1] : vector<16x32xf32> to vector<16xf32>
    %63 = vector.shape_cast %62 : vector<16xf32> to vector<16x1xf32>
    %cst_30 = arith.constant 3.200000e+01 : f32
    %64 = vector.broadcast %cst_30 : f32 to vector<16x1xf32>
    %65 = arith.divf %63, %64 : vector<16x1xf32>
    %66 = vector.broadcast %65 : vector<16x1xf32> to vector<16x32xf32>
    %67 = arith.subf %61, %66 : vector<16x32xf32>
    %68 = arith.mulf %67, %67 : vector<16x32xf32>
    %cst_31 = arith.constant dense<0.000000e+00> : vector<16xf32>
    %69 = vector.multi_reduction <add>, %68, %cst_31 [1] : vector<16x32xf32> to vector<16xf32>
    %70 = vector.shape_cast %69 : vector<16xf32> to vector<16x1xf32>
    %cst_32 = arith.constant 3.200000e+01 : f32
    %71 = vector.broadcast %cst_32 : f32 to vector<16x1xf32>
    %72 = arith.divf %70, %71 : vector<16x1xf32>
    %73 = vector.broadcast %65 : vector<16x1xf32> to vector<16x32xf32>
    %74 = arith.subf %61, %73 : vector<16x32xf32>
    %cst_33 = arith.constant 9.99999974E-6 : f32
    %75 = vector.broadcast %cst_33 : f32 to vector<16x1xf32>
    %76 = arith.addf %72, %75 : vector<16x1xf32>
    %77 = math.rsqrt %76 : vector<16x1xf32>
    %78 = vector.broadcast %77 : vector<16x1xf32> to vector<16x32xf32>
    %79 = arith.mulf %74, %78 : vector<16x32xf32>
    %c0_34 = arith.constant 0 : index
    %c0_35 = arith.constant 0 : index
    %80 = vector.load %arg9[%c0_34, %c0_35] : memref<1x32xf32, #tpu.memory_space<vmem>>, vector<1x32xf32>
    %81 = vector.broadcast %80 : vector<1x32xf32> to vector<16x32xf32>
    %82 = arith.mulf %79, %81 : vector<16x32xf32>
    %c0_36 = arith.constant 0 : index
    %c0_37 = arith.constant 0 : index
    %83 = vector.load %arg10[%c0_36, %c0_37] : memref<1x32xf32, #tpu.memory_space<vmem>>, vector<1x32xf32>
    %84 = vector.broadcast %83 : vector<1x32xf32> to vector<16x32xf32>
    %85 = arith.addf %82, %84 : vector<16x32xf32>
    %86 = vector.shape_cast %85 : vector<16x32xf32> to vector<16x1x32xf32>
    %c0_38 = arith.constant 0 : index
    %c0_39 = arith.constant 0 : index
    %c0_40 = arith.constant 0 : index
    %87 = vector.load %arg11[%c0_38, %c0_39, %c0_40] : memref<16x16x32xf32, #tpu.memory_space<vmem>>, vector<16x16x32xf32>
    %88 = vector.broadcast %86 : vector<16x1x32xf32> to vector<16x16x32xf32>
    %89 = arith.mulf %88, %87 : vector<16x16x32xf32>
    %cst_41 = arith.constant dense<0.000000e+00> : vector<16x32xf32>
    %90 = vector.multi_reduction <add>, %89, %cst_41 [0] : vector<16x16x32xf32> to vector<16x32xf32>
    %91 = arith.mulf %90, %90 : vector<16x32xf32>
    %92 = arith.mulf %90, %91 : vector<16x32xf32>
    %cst_42 = arith.constant 4.471500e-02 : f32
    %93 = vector.broadcast %cst_42 : f32 to vector<16x32xf32>
    %94 = arith.mulf %93, %92 : vector<16x32xf32>
    %95 = arith.addf %90, %94 : vector<16x32xf32>
    %cst_43 = arith.constant 0.797884583 : f32
    %96 = vector.broadcast %cst_43 : f32 to vector<16x32xf32>
    %97 = arith.mulf %96, %95 : vector<16x32xf32>
    %98 = math.tanh %97 : vector<16x32xf32>
    %cst_44 = arith.constant 1.000000e+00 : f32
    %99 = vector.broadcast %cst_44 : f32 to vector<16x32xf32>
    %100 = arith.addf %99, %98 : vector<16x32xf32>
    %cst_45 = arith.constant 5.000000e-01 : f32
    %101 = vector.broadcast %cst_45 : f32 to vector<16x32xf32>
    %102 = arith.mulf %101, %100 : vector<16x32xf32>
    %103 = arith.mulf %90, %102 : vector<16x32xf32>
    %104 = arith.truncf %103 : vector<16x32xf32> to vector<16x32xbf16>
    %c0_46 = arith.constant 0 : index
    %c0_47 = arith.constant 0 : index
    %105 = vector.load %arg12[%c0_46, %c0_47] : memref<32x32xbf16, #tpu.memory_space<vmem>>, vector<32x32xbf16>
    %cst_48 = arith.constant dense<0.000000e+00> : vector<16x32xf32>
    %106 = tpu.matmul %104, %105, %cst_48 {dimension_numbers = #tpu.dot_dimension_numbers<[1], [0], [0], [1], [0, 0, 1, 1], [], []>} : vector<16x32xbf16>, vector<32x32xbf16>, vector<16x32xf32> -> vector<16x32xf32>
    %c0_49 = arith.constant 0 : index
    %c0_50 = arith.constant 0 : index
    %107 = vector.load %arg14[%c0_49, %c0_50] : memref<1x32xf32, #tpu.memory_space<vmem>>, vector<1x32xf32>
    %108 = vector.broadcast %107 : vector<1x32xf32> to vector<16x32xf32>
    %109 = arith.addf %106, %108 : vector<16x32xf32>
    %c0_51 = arith.constant 0 : index
    %c0_52 = arith.constant 0 : index
    %110 = vector.load %arg13[%c0_51, %c0_52] : memref<32x32xbf16, #tpu.memory_space<vmem>>, vector<32x32xbf16>
    %cst_53 = arith.constant dense<0.000000e+00> : vector<16x32xf32>
    %111 = tpu.matmul %104, %110, %cst_53 {dimension_numbers = #tpu.dot_dimension_numbers<[1], [0], [0], [1], [0, 0, 1, 1], [], []>} : vector<16x32xbf16>, vector<32x32xbf16>, vector<16x32xf32> -> vector<16x32xf32>
    %c0_54 = arith.constant 0 : index
    %c0_55 = arith.constant 0 : index
    %112 = vector.load %arg15[%c0_54, %c0_55] : memref<1x32xf32, #tpu.memory_space<vmem>>, vector<1x32xf32>
    %113 = vector.broadcast %112 : vector<1x32xf32> to vector<16x32xf32>
    %114 = arith.addf %111, %113 : vector<16x32xf32>
    %115 = arith.negf %114 : vector<16x32xf32>
    %116 = math.exp %115 : vector<16x32xf32>
    %cst_56 = arith.constant 1.000000e+00 : f32
    %117 = vector.broadcast %cst_56 : f32 to vector<16x32xf32>
    %118 = arith.addf %117, %116 : vector<16x32xf32>
    %119 = arith.divf %117, %118 : vector<16x32xf32>
    %120 = arith.mulf %109, %119 : vector<16x32xf32>
    %121 = arith.addf %61, %120 : vector<16x32xf32>
    %cst_57 = arith.constant dense<0.000000e+00> : vector<16xf32>
    %122 = vector.multi_reduction <add>, %121, %cst_57 [1] : vector<16x32xf32> to vector<16xf32>
    %123 = vector.shape_cast %122 : vector<16xf32> to vector<16x1xf32>
    %cst_58 = arith.constant 3.200000e+01 : f32
    %124 = vector.broadcast %cst_58 : f32 to vector<16x1xf32>
    %125 = arith.divf %123, %124 : vector<16x1xf32>
    %126 = vector.broadcast %125 : vector<16x1xf32> to vector<16x32xf32>
    %127 = arith.subf %121, %126 : vector<16x32xf32>
    %128 = arith.mulf %127, %127 : vector<16x32xf32>
    %cst_59 = arith.constant dense<0.000000e+00> : vector<16xf32>
    %129 = vector.multi_reduction <add>, %128, %cst_59 [1] : vector<16x32xf32> to vector<16xf32>
    %130 = vector.shape_cast %129 : vector<16xf32> to vector<16x1xf32>
    %cst_60 = arith.constant 3.200000e+01 : f32
    %131 = vector.broadcast %cst_60 : f32 to vector<16x1xf32>
    %132 = arith.divf %130, %131 : vector<16x1xf32>
    %133 = vector.broadcast %125 : vector<16x1xf32> to vector<16x32xf32>
    %134 = arith.subf %121, %133 : vector<16x32xf32>
    %cst_61 = arith.constant 9.99999974E-6 : f32
    %135 = vector.broadcast %cst_61 : f32 to vector<16x1xf32>
    %136 = arith.addf %132, %135 : vector<16x1xf32>
    %137 = math.rsqrt %136 : vector<16x1xf32>
    %138 = vector.broadcast %137 : vector<16x1xf32> to vector<16x32xf32>
    %139 = arith.mulf %134, %138 : vector<16x32xf32>
    %c0_62 = arith.constant 0 : index
    %c0_63 = arith.constant 0 : index
    %140 = vector.load %arg16[%c0_62, %c0_63] : memref<1x32xf32, #tpu.memory_space<vmem>>, vector<1x32xf32>
    %141 = vector.broadcast %140 : vector<1x32xf32> to vector<16x32xf32>
    %142 = arith.mulf %139, %141 : vector<16x32xf32>
    %c0_64 = arith.constant 0 : index
    %c0_65 = arith.constant 0 : index
    %143 = vector.load %arg17[%c0_64, %c0_65] : memref<1x32xf32, #tpu.memory_space<vmem>>, vector<1x32xf32>
    %144 = vector.broadcast %143 : vector<1x32xf32> to vector<16x32xf32>
    %145 = arith.addf %142, %144 : vector<16x32xf32>
    %146 = arith.truncf %145 : vector<16x32xf32> to vector<16x32xbf16>
    %c0_66 = arith.constant 0 : index
    %c0_67 = arith.constant 0 : index
    %147 = vector.load %arg18[%c0_66, %c0_67] : memref<32x64xbf16, #tpu.memory_space<vmem>>, vector<32x64xbf16>
    %cst_68 = arith.constant dense<0.000000e+00> : vector<16x64xf32>
    %148 = tpu.matmul %146, %147, %cst_68 {dimension_numbers = #tpu.dot_dimension_numbers<[1], [0], [0], [1], [0, 0, 1, 1], [], []>} : vector<16x32xbf16>, vector<32x64xbf16>, vector<16x64xf32> -> vector<16x64xf32>
    %c0_69 = arith.constant 0 : index
    %c0_70 = arith.constant 0 : index
    %149 = vector.load %arg19[%c0_69, %c0_70] : memref<1x64xf32, #tpu.memory_space<vmem>>, vector<1x64xf32>
    %150 = vector.broadcast %149 : vector<1x64xf32> to vector<16x64xf32>
    %151 = arith.addf %148, %150 : vector<16x64xf32>
    %152 = arith.mulf %151, %151 : vector<16x64xf32>
    %153 = arith.mulf %151, %152 : vector<16x64xf32>
    %cst_71 = arith.constant 4.471500e-02 : f32
    %154 = vector.broadcast %cst_71 : f32 to vector<16x64xf32>
    %155 = arith.mulf %154, %153 : vector<16x64xf32>
    %156 = arith.addf %151, %155 : vector<16x64xf32>
    %cst_72 = arith.constant 0.797884583 : f32
    %157 = vector.broadcast %cst_72 : f32 to vector<16x64xf32>
    %158 = arith.mulf %157, %156 : vector<16x64xf32>
    %159 = math.tanh %158 : vector<16x64xf32>
    %cst_73 = arith.constant 1.000000e+00 : f32
    %160 = vector.broadcast %cst_73 : f32 to vector<16x64xf32>
    %161 = arith.addf %160, %159 : vector<16x64xf32>
    %cst_74 = arith.constant 5.000000e-01 : f32
    %162 = vector.broadcast %cst_74 : f32 to vector<16x64xf32>
    %163 = arith.mulf %162, %161 : vector<16x64xf32>
    %164 = arith.mulf %151, %163 : vector<16x64xf32>
    %165 = arith.truncf %164 : vector<16x64xf32> to vector<16x64xbf16>
    %c0_75 = arith.constant 0 : index
    %c0_76 = arith.constant 0 : index
    %166 = vector.load %arg20[%c0_75, %c0_76] : memref<64x32xbf16, #tpu.memory_space<vmem>>, vector<64x32xbf16>
    %cst_77 = arith.constant dense<0.000000e+00> : vector<16x32xf32>
    %167 = tpu.matmul %165, %166, %cst_77 {dimension_numbers = #tpu.dot_dimension_numbers<[1], [0], [0], [1], [0, 0, 1, 1], [], []>} : vector<16x64xbf16>, vector<64x32xbf16>, vector<16x32xf32> -> vector<16x32xf32>
    %c0_78 = arith.constant 0 : index
    %c0_79 = arith.constant 0 : index
    %168 = vector.load %arg21[%c0_78, %c0_79] : memref<1x32xf32, #tpu.memory_space<vmem>>, vector<1x32xf32>
    %169 = vector.broadcast %168 : vector<1x32xf32> to vector<16x32xf32>
    %170 = arith.addf %167, %169 : vector<16x32xf32>
    %171 = arith.addf %121, %170 : vector<16x32xf32>
    %cst_80 = arith.constant dense<0.000000e+00> : vector<16xf32>
    %172 = vector.multi_reduction <add>, %171, %cst_80 [1] : vector<16x32xf32> to vector<16xf32>
    %173 = vector.shape_cast %172 : vector<16xf32> to vector<16x1xf32>
    %cst_81 = arith.constant 3.200000e+01 : f32
    %174 = vector.broadcast %cst_81 : f32 to vector<16x1xf32>
    %175 = arith.divf %173, %174 : vector<16x1xf32>
    %176 = vector.broadcast %175 : vector<16x1xf32> to vector<16x32xf32>
    %177 = arith.subf %171, %176 : vector<16x32xf32>
    %178 = arith.mulf %177, %177 : vector<16x32xf32>
    %cst_82 = arith.constant dense<0.000000e+00> : vector<16xf32>
    %179 = vector.multi_reduction <add>, %178, %cst_82 [1] : vector<16x32xf32> to vector<16xf32>
    %180 = vector.shape_cast %179 : vector<16xf32> to vector<16x1xf32>
    %cst_83 = arith.constant 3.200000e+01 : f32
    %181 = vector.broadcast %cst_83 : f32 to vector<16x1xf32>
    %182 = arith.divf %180, %181 : vector<16x1xf32>
    %183 = vector.broadcast %175 : vector<16x1xf32> to vector<16x32xf32>
    %184 = arith.subf %171, %183 : vector<16x32xf32>
    %cst_84 = arith.constant 9.99999974E-6 : f32
    %185 = vector.broadcast %cst_84 : f32 to vector<16x1xf32>
    %186 = arith.addf %182, %185 : vector<16x1xf32>
    %187 = math.rsqrt %186 : vector<16x1xf32>
    %188 = vector.broadcast %187 : vector<16x1xf32> to vector<16x32xf32>
    %189 = arith.mulf %184, %188 : vector<16x32xf32>
    %c0_85 = arith.constant 0 : index
    %c0_86 = arith.constant 0 : index
    %190 = vector.load %arg22[%c0_85, %c0_86] : memref<1x32xf32, #tpu.memory_space<vmem>>, vector<1x32xf32>
    %191 = vector.broadcast %190 : vector<1x32xf32> to vector<16x32xf32>
    %192 = arith.mulf %189, %191 : vector<16x32xf32>
    %c0_87 = arith.constant 0 : index
    %c0_88 = arith.constant 0 : index
    %193 = vector.load %arg23[%c0_87, %c0_88] : memref<1x32xf32, #tpu.memory_space<vmem>>, vector<1x32xf32>
    %194 = vector.broadcast %193 : vector<1x32xf32> to vector<16x32xf32>
    %195 = arith.addf %192, %194 : vector<16x32xf32>
    %196 = arith.truncf %195 : vector<16x32xf32> to vector<16x32xbf16>
    %c0_89 = arith.constant 0 : index
    %c0_90 = arith.constant 0 : index
    %197 = vector.load %arg24[%c0_89, %c0_90] : memref<32x16xbf16, #tpu.memory_space<vmem>>, vector<32x16xbf16>
    %cst_91 = arith.constant dense<0.000000e+00> : vector<16x16xf32>
    %198 = tpu.matmul %196, %197, %cst_91 {dimension_numbers = #tpu.dot_dimension_numbers<[1], [0], [0], [1], [0, 0, 1, 1], [], []>} : vector<16x32xbf16>, vector<32x16xbf16>, vector<16x16xf32> -> vector<16x16xf32>
    %c0_92 = arith.constant 0 : index
    %c0_93 = arith.constant 0 : index
    %199 = vector.load %arg25[%c0_92, %c0_93] : memref<1x16xf32, #tpu.memory_space<vmem>>, vector<1x16xf32>
    %200 = vector.broadcast %199 : vector<1x16xf32> to vector<16x16xf32>
    %201 = arith.addf %198, %200 : vector<16x16xf32>
    %202 = vector.shape_cast %201 : vector<16x16xf32> to vector<1x16x16xf32>
    %c0_94 = arith.constant 0 : index
    %c0_95 = arith.constant 0 : index
    %c0_96 = arith.constant 0 : index
    %203 = vector.load %arg26[%c0_94, %c0_95, %c0_96] : memref<1x16x16xf32, #tpu.memory_space<vmem>>, vector<1x16x16xf32>
    tpu.vector_store %arg26[%c0_94, %c0_95, %c0_96], %202 {strides = array<i32>} : memref<1x16x16xf32, #tpu.memory_space<vmem>>, vector<1x16x16xf32>,
    return
  }
  func.func @transform_0(%arg0: i32) -> (i32, i32, i32) {
    %c0_i32 = arith.constant 0 : i32
    %c0_i32_0 = arith.constant 0 : i32
    %c0_i32_1 = arith.constant 0 : i32
    return %arg0, %c0_i32, %c0_i32_0 : i32, i32, i32
  }
  func.func @transform_1(%arg0: i32) -> (i32, i32) {
    %c0_i32 = arith.constant 0 : i32
    %c0_i32_0 = arith.constant 0 : i32
    %c0_i32_1 = arith.constant 0 : i32
    return %c0_i32, %c0_i32_0 : i32, i32
  }
  func.func @transform_2(%arg0: i32) -> (i32, i32) {
    %c0_i32 = arith.constant 0 : i32
    %c0_i32_0 = arith.constant 0 : i32
    %c0_i32_1 = arith.constant 0 : i32
    return %c0_i32, %c0_i32_0 : i32, i32
  }
  func.func @transform_3(%arg0: i32) -> (i32, i32, i32) {
    %c0_i32 = arith.constant 0 : i32
    %c0_i32_0 = arith.constant 0 : i32
    %c0_i32_1 = arith.constant 0 : i32
    %c0_i32_2 = arith.constant 0 : i32
    return %c0_i32, %c0_i32_0, %c0_i32_1 : i32, i32, i32
  }
  func.func @transform_4(%arg0: i32) -> (i32, i32) {
    %c0_i32 = arith.constant 0 : i32
    %c0_i32_0 = arith.constant 0 : i32
    %c0_i32_1 = arith.constant 0 : i32
    return %c0_i32, %c0_i32_0 : i32, i32
  }
  func.func @transform_5(%arg0: i32) -> (i32, i32) {
    %c0_i32 = arith.constant 0 : i32
    %c0_i32_0 = arith.constant 0 : i32
    %c0_i32_1 = arith.constant 0 : i32
    return %c0_i32, %c0_i32_0 : i32, i32
  }
  func.func @transform_6(%arg0: i32) -> (i32, i32) {
    %c0_i32 = arith.constant 0 : i32
    %c0_i32_0 = arith.constant 0 : i32
    %c0_i32_1 = arith.constant 0 : i32
    return %c0_i32, %c0_i32_0 : i32, i32
  }
  func.func @transform_7(%arg0: i32) -> (i32, i32) {
    %c0_i32 = arith.constant 0 : i32
    %c0_i32_0 = arith.constant 0 : i32
    %c0_i32_1 = arith.constant 0 : i32
    return %c0_i32, %c0_i32_0 : i32, i32
  }
  func.func @transform_8(%arg0: i32) -> (i32, i32) {
    %c0_i32 = arith.constant 0 : i32
    %c0_i32_0 = arith.constant 0 : i32
    %c0_i32_1 = arith.constant 0 : i32
    return %c0_i32, %c0_i32_0 : i32, i32
  }
  func.func @transform_9(%arg0: i32) -> (i32, i32) {
    %c0_i32 = arith.constant 0 : i32
    %c0_i32_0 = arith.constant 0 : i32
    %c0_i32_1 = arith.constant 0 : i32
    return %c0_i32, %c0_i32_0 : i32, i32
  }
  func.func @transform_10(%arg0: i32) -> (i32, i32, i32) {
    %c0_i32 = arith.constant 0 : i32
    %c0_i32_0 = arith.constant 0 : i32
    %c0_i32_1 = arith.constant 0 : i32
    %c0_i32_2 = arith.constant 0 : i32
    return %c0_i32, %c0_i32_0, %c0_i32_1 : i32, i32, i32
  }
  func.func @transform_11(%arg0: i32) -> (i32, i32) {
    %c0_i32 = arith.constant 0 : i32
    %c0_i32_0 = arith.constant 0 : i32
    %c0_i32_1 = arith.constant 0 : i32
    return %c0_i32, %c0_i32_0 : i32, i32
  }
  func.func @transform_12(%arg0: i32) -> (i32, i32) {
    %c0_i32 = arith.constant 0 : i32
    %c0_i32_0 = arith.constant 0 : i32
    %c0_i32_1 = arith.constant 0 : i32
    return %c0_i32, %c0_i32_0 : i32, i32
  }
  func.func @transform_13(%arg0: i32) -> (i32, i32) {
    %c0_i32 = arith.constant 0 : i32
    %c0_i32_0 = arith.constant 0 : i32
    %c0_i32_1 = arith.constant 0 : i32
    return %c0_i32, %c0_i32_0 : i32, i32
  }
  func.func @transform_14(%arg0: i32) -> (i32, i32) {
    %c0_i32 = arith.constant 0 : i32
    %c0_i32_0 = arith.constant 0 : i32
    %c0_i32_1 = arith.constant 0 : i32
    return %c0_i32, %c0_i32_0 : i32, i32
  }
  func.func @transform_15(%arg0: i32) -> (i32, i32) {
    %c0_i32 = arith.constant 0 : i32
    %c0_i32_0 = arith.constant 0 : i32
    %c0_i32_1 = arith.constant 0 : i32
    return %c0_i32, %c0_i32_0 : i32, i32
  }
  func.func @transform_16(%arg0: i32) -> (i32, i32) {
    %c0_i32 = arith.constant 0 : i32
    %c0_i32_0 = arith.constant 0 : i32
    %c0_i32_1 = arith.constant 0 : i32
    return %c0_i32, %c0_i32_0 : i32, i32
  }
  func.func @transform_17(%arg0: i32) -> (i32, i32) {
    %c0_i32 = arith.constant 0 : i32
    %c0_i32_0 = arith.constant 0 : i32
    %c0_i32_1 = arith.constant 0 : i32
    return %c0_i32, %c0_i32_0 : i32, i32
  }
  func.func @transform_18(%arg0: i32) -> (i32, i32) {
    %c0_i32 = arith.constant 0 : i32
    %c0_i32_0 = arith.constant 0 : i32
    %c0_i32_1 = arith.constant 0 : i32
    return %c0_i32, %c0_i32_0 : i32, i32
  }
  func.func @transform_19(%arg0: i32) -> (i32, i32) {
    %c0_i32 = arith.constant 0 : i32
    %c0_i32_0 = arith.constant 0 : i32
    %c0_i32_1 = arith.constant 0 : i32
    return %c0_i32, %c0_i32_0 : i32, i32
  }
  func.func @transform_20(%arg0: i32) -> (i32, i32) {
    %c0_i32 = arith.constant 0 : i32
    %c0_i32_0 = arith.constant 0 : i32
    %c0_i32_1 = arith.constant 0 : i32
    return %c0_i32, %c0_i32_0 : i32, i32
  }
  func.func @transform_21(%arg0: i32) -> (i32, i32) {
    %c0_i32 = arith.constant 0 : i32
    %c0_i32_0 = arith.constant 0 : i32
    %c0_i32_1 = arith.constant 0 : i32
    return %c0_i32, %c0_i32_0 : i32, i32
  }
  func.func @transform_22(%arg0: i32) -> (i32, i32) {
    %c0_i32 = arith.constant 0 : i32
    %c0_i32_0 = arith.constant 0 : i32
    %c0_i32_1 = arith.constant 0 : i32
    return %c0_i32, %c0_i32_0 : i32, i32
  }
  func.func @transform_23(%arg0: i32) -> (i32, i32) {
    %c0_i32 = arith.constant 0 : i32
    %c0_i32_0 = arith.constant 0 : i32
    %c0_i32_1 = arith.constant 0 : i32
    return %c0_i32, %c0_i32_0 : i32, i32
  }
  func.func @transform_24(%arg0: i32) -> (i32, i32) {
    %c0_i32 = arith.constant 0 : i32
    %c0_i32_0 = arith.constant 0 : i32
    %c0_i32_1 = arith.constant 0 : i32
    return %c0_i32, %c0_i32_0 : i32, i32
  }
  func.func @transform_25(%arg0: i32) -> (i32, i32, i32) {
    %c0_i32 = arith.constant 0 : i32
    %c0_i32_0 = arith.constant 0 : i32
    %c0_i32_1 = arith.constant 0 : i32
    return %arg0, %c0_i32, %c0_i32_0 : i32, i32, i32
  }
}

</mosaic_0001>

<bundles_post_ra>
// kernel: forward.1
= control target key start
LH: loop header
LB: loop body
LE: loop exit
PB: predicated region body
PF: predicated region fallthrough
CT: control target
= control target key end

     0   :  { %s3239_s0 = inlined_call_operand.vmem [shape: f32[2,16,32], index: 0, kind: input, shape index: {}]   ;;  %s3240_s1 = inlined_call_operand.vmem [shape: f32[1,32], index: 1, kind: input, shape index: {}]   ;;  %s3241_s2 = inlined_call_operand.vmem [shape: f32[1,32], index: 2, kind: input, shape index: {}]   ;;  %s3242_s3 = inlined_call_operand.vmem [shape: f32[16,16,32], index: 3, kind: input, shape index: {}]   ;;  %s3243_s4 = inlined_call_operand.vmem [shape: bf16[32,32], index: 4, kind: input, shape index: {}]   ;;  %s3244_s5 = inlined_call_operand.vmem [shape: bf16[32,32], index: 5, kind: input, shape index: {}]   ;;  %s3245_s6 = inlined_call_operand.vmem [shape: f32[1,32], index: 6, kind: input, shape index: {}]   ;;  %s3246_s7 = inlined_call_operand.vmem [shape: f32[1,32], index: 7, kind: input, shape index: {}]   ;;  %s3247_s8 = inlined_call_operand.vmem [shape: f32[1,32], index: 8, kind: input, shape index: {}]   ;;  %s3248_s9 = inlined_call_operand.vmem [shape: f32[1,32], index: 9, kind: input, shape index: {}]   ;;  %s3249_s10 = inlined_call_operand.hbm [shape: f32[16,16,32], index: 10, kind: input, shape index: {}]   ;;  %s3250_s11 = inlined_call_operand.vmem [shape: bf16[32,32], index: 11, kind: input, shape index: {}]   ;;  %s3251_s12 = inlined_call_operand.vmem [shape: bf16[32,32], index: 12, kind: input, shape index: {}]   ;;  %s3252_s13 = inlined_call_operand.vmem [shape: f32[1,32], index: 13, kind: input, shape index: {}]   ;;  %s3253_s14 = inlined_call_operand.vmem [shape: f32[1,32], index: 14, kind: input, shape index: {}]   ;;  %s3254_s15 = inlined_call_operand.vmem [shape: f32[1,32], index: 15, kind: input, shape index: {}]   ;;  %s3255_s16 = inlined_call_operand.vmem [shape: f32[1,32], index: 16, kind: input, shape index: {}]   ;;  %s3256_s17 = inlined_call_operand.vmem [shape: bf16[32,64], index: 17, kind: input, shape index: {}]   ;;  %s3257_s18 = inlined_call_operand.vmem [shape: f32[1,64], index: 18, kind: input, shape index: {}]   ;;  %s3258_s19 = inlined_call_operand.vmem [shape: bf16[64,32], index: 19, kind: input, shape index: {}]   ;;  %s3259_s20 = inlined_call_operand.vmem [shape: f32[1,32], index: 20, kind: input, shape index: {}]   ;;  %s3260_s21 = inlined_call_operand.vmem [shape: f32[1,32], index: 21, kind: input, shape index: {}]   ;;  %s3261_s22 = inlined_call_operand.vmem [shape: f32[1,32], index: 22, kind: input, shape index: {}]   ;;  %s3262_s23 = inlined_call_operand.vmem [shape: bf16[32,16], index: 23, kind: input, shape index: {}]   ;;  %s3263_s24 = inlined_call_operand.vmem [shape: f32[1,16], index: 24, kind: input, shape index: {}]   ;;  %s3264_s25 = inlined_call_operand.hbm [shape: f32[2,16,16], index: 25, kind: output, shape index: {}]  }
   0x1   :  { %3276 = sst [smem:[#allocation14_spill]] %s3239_s0 }
   0x2   :  { %3277 = sst [smem:[#allocation15_spill]] %s3240_s1 }
   0x3   :  { %3278 = sst [smem:[#allocation16_spill]] %s3241_s2 }
   0x4   :  { %3279 = sst [smem:[#allocation17_spill]] %s3242_s3 }
   0x5   :  { %3280 = sst [smem:[#allocation18_spill]] %s3243_s4 }
   0x6   :  { %3281 = sst [smem:[#allocation19_spill]] %s3244_s5 }
   0x7   :  { %3282 = sst [smem:[#allocation20_spill]] %s3245_s6 }
   0x8   :  { %3283 = sst [smem:[#allocation21_spill]] %s3246_s7 }
   0x9   :  { %3284 = sst [smem:[#allocation22_spill]] %s3247_s8 }
   0xa   :  { %3285 = sst [smem:[#allocation23_spill]] %s3248_s9 }
   0xb   :  { %3286 = sst [smem:[#allocation24_spill]] %s3249_s10 }
   0xc   :  { %30 = vsyncpa [#allocation3], 0 }
   0xd   :  { %31 = vsyncpa [#allocation4], 0 }
   0xe   :  { %33 = vsyncpa [#allocation4 + $0x1], 0  ;;  %s2724_s29 = smov 0   ;;  %s2726_s2 = smov 0  }
   0xf   :  { %s2728_s6 = smov 0   ;;  %s2730_s30 = smov 0  }
  0x10 LB: > { %3287 = sst [smem:[#allocation8_spill]] %s2571_s29  ;;  %s2745_s7 = sadd.s32 4294967295, %s2583_s30   ;;  %s2583_s30 = sphi %s2730_s30, %s3312_s30   ;;  %s2579_s6 = sphi %s2728_s6, %s3314_s6   ;;  %s2575_s2 = sphi %s2726_s2, %s3316_s2   ;;  %s2571_s29 = sphi %s2724_s29, %s3315_s29  }
  0x11   : > { %3288 = sst [smem:[#allocation9_spill]] %s2579_s6  ;;  %s2235_s3 = sadd.s32 4294967294, %s2583_s30  }
  0x12   : > { %3289 = sst [smem:[#allocation10_spill]] %s2583_s30  ;;  %s2749_s26 = sadd.s32 1, %s2583_s30  }
  0x13   : > { %3290 = sst [smem:[#allocation11_spill]] %s2749_s26  ;;  %s576_s1 = sadd.s32 1, %s2579_s6 }
  0x14   : > { %s573_s8 = ssub.s32 %s2583_s30, %s2749_s26  ;;  %p586_p0 = scmp.ne.s32.totalorder %s2579_s6, %s2575_s2 }
  0x15   : > { %p574_p1 = scmp.eq.s32.totalorder %s573_s8, 0  ;;  %p587_p2 = scmp.eq.s32.totalorder %s2745_s7, 1 }
  0x16   : > { %p592_p3 = scmp.ne.s32.totalorder %s2575_s2, %s2571_s29  ;;  %p593_p4 = scmp.eq.s32.totalorder %s2235_s3, 1 }
  0x17   : > { %s2760_s27 = scalar_select %p574_p1, %s2579_s6, %s576_s1  }
  0x18   : > { %p2762_p5 = por %p587_p2, %p586_p0  ;;  %p2766_p6 = por %p593_p4, %p592_p3 }
  0x19   : > { %3291 = sst [smem:[#allocation12_spill]] %s2760_s27  ;;  %p2236_p7 = scmp.ge.s32.totalorder %s2583_s30, 1 }
  0x1a   : > { %s3293_s28 = scalar_select %p2766_p6, 1, 0 }
  0x1b   : > { %p600_p8 = scmp.lt.s32.totalorder %s2583_s30, 3  ;;  %p2390_p9 = scmp.eq.s32.totalorder %s2745_s7, 0 }
  0x1c   : > { %3294 = sst [smem:[#allocation13_spill]] %s3293_s28  ;;  %s2585_s5 = smov [#allocation2]  }
  0x1d   : > { %p2773_p10 = pnand %p2236_p7, %p600_p8  ;;  %s639_s0 = sshll.u32 %s2585_s5, 4  ;;  %s640_s0 = int_to_ptr.vmem [resolvable:$true] %s639_s0 }
  0x1e   : > { %s2504_s3 = scalar_lea.vmem %s640_s0, 4096  ;;  %p2512_p3 = scmp.lt.s32.totalorder %s640_s0, %s640_s0 }
  0x1f   : > { %p2382_p11 = pneg %p2773_p10  ;;  %p2505_p0 = scmp.ne.s32.totalorder %s640_s0, %s2504_s3 }
  0x20   : > { %p2513_p4 = scmp.lt.s32.totalorder %s2504_s3, %s2504_s3 }
  0x21   : > { %p2383_p12 = pnand %p2390_p9, %p2382_p11 }
  0x22   : > { %p2514_p6 = por %p2513_p4, %p2512_p3 }
  0x23   : > { %p2495_p13 = pneg %p2383_p12 }
  0x25   : > { %p2507_p1 = pnand %p2505_p0, %p2495_p13 }
  0x27   : > { %p2508_p2 = pneg %p2507_p1 }
  0x29   : > { %p2515_p7 = pnand %p2514_p6, %p2508_p2 }
  0x2b   : > { %2518 = shalt.err (!%p2515_p7)
}
  0x2c   : > { %s2586_s1 = smov 128   ;;  %s2587_s8 = smov 8  }
  0x2d   : > { %s3296_s10 = sld [smem:[#allocation24_spill]] }
  0x2f   : > { %705 = sbr.rel (%p2773_p10) target bundleno = 2559 (0x9ff), region = 120 }
  0x33   : > { %2385 = dma.hbm_to_vmem [thread:$0]  (!%p2383_p12), %s3296_s10, 4096, %s640_s0, [#allocation3], %s2586_s1, %s2586_s1, %s2587_s8  }
  0x34   : > { %2562 = dma.done.wait (%p2390_p9), [#allocation3], 4096  }
  0x35   : > { %2564 = vsyncadd (%p2390_p9), [#allocation3], 4294963200  ;;  %p773_p8 = scmp.lt.s32.totalorder %s2745_s7, 1  ;;  %s3297_s29 = sld [smem:[#allocation14_spill]]  ;;  %vm781_vm0 = vcmask 261120   ;;  %v2588_v16 = vmov 0.0   ;;  %v833_v27 = vlaneseq }
  0x36   : > { %s3300_s9 = sld [smem:[#allocation19_spill]]  ;;  %2316 = vmatprep.subr.bf16.mxu0 %v2588_v16  ;;  %2324 = vmatprep.subr.bf16.mxu1 %v2588_v16  ;;  %vm2589_vm1 = vmmov 0   ;;  %v2590_v25 = vmov 1966171168   ;;  %vm1985_vm2 = vcmask 523264   ;;  %vm2144_vm3 = vcmask 130048  }
  0x37   : > { %s774_s5 = scalar_select %p773_p8, %s2745_s7, 1  ;;  %2320 = vmatprep.mubr.msk.bf16.mxu0 %vm2589_vm1, %v2588_v16  ;;  %2328 = vmatprep.mubr.msk.bf16.mxu1 %vm2589_vm1, %v2588_v16  ;;  %v831_v26 = vunpack.c.l.s4 %v2590_v25  ;;  %v834_v29 = vshrl.u32 %v833_v27, 7 }
  0x38   : > { %s3301_s6 = sld [smem:[#allocation15_spill]] }
  0x39   : > { %s2291_s3 = sshll.u32 %s774_s5, 4  ;;  %v832_v28 = vunpack.c.0.s8 %v831_v26  ;;  %s3302_s28 = sld [smem:[#allocation16_spill]]  ;;  %v2838_v41 = vsub.s32 0, %v834_v29 }
  0x3a   : > { %s3303_s8 = sld [smem:[#allocation17_spill]] }
  0x3b   : > { %s777_s30 = scalar_lea.vmem %s3297_s29, %s2291_s3  ;;  %v2835_v34 = vsub.s32 %v832_v28, %v834_v29  ;;  %s3304_s3 = sld [smem:[#allocation21_spill]] }
  0x3c   : > { %v2795_v0 = vld [vmem:[%s777_s30] sm:$0xff]  ;;  %v2797_v1 = vld [vmem:[%s777_s30 + $0x8] sm:$0xff]  ;;  %s3298_s30 = sld [smem:[#allocation18_spill]] }
  0x3d   : > { %v782_v2 = vsel %vm781_vm0, %v2795_v0, 0.0  ;;  %v785_v3 = vsel %vm781_vm0, %v2797_v1, 0.0  ;;  %v2434_v15 = vld [vmem:[%s3300_s9 + $0x8] sm:$0xff]   ;;  %v2436_v18 = vld [vmem:[%s3300_s9] sm:$0xff]   ;;  %s3307_s5 = sld [smem:[#allocation23_spill]] }
  0x3e   : > { %783 = vadd.xlane.f32.xlu0 %v782_v2  ;;  %2325 = vmatpush3.bf16.msra.mxu1 %v2434_v15  ;;  %v2244_v31 = vld [vmem:[%s3301_s6] ss:$0 sm:$0xff]  ;;  %s2292_s6 = sshll.u32 %s2745_s7, 8  ;;  %s2591_s7 = smov [#allocation5]  }
  0x3f   : > { %2326 = vmatprep.subr.bf16.mxu1 %v2588_v16  ;;  %v2245_v33 = vld [vmem:[%s3302_s28] ss:$0 sm:$0xff]  ;;  %s3306_s28 = sld [smem:[#allocation22_spill]]  ;;  %s3197_s1 = scalar_lea.hbm %s3264_s25, %s2292_s6 }
  0x40   : > { %v927_v51 = vld [vmem:[%s3303_s8] sm:$0xff]  ;;  %v929_v52 = vld [vmem:[%s3303_s8 + $0x10] sm:$0xff]  ;;  %v928_v57 = vld [vmem:[%s3303_s8 + $0x8] sm:$0xff] }
  0x41   : > { %v930_v58 = vld [vmem:[%s3303_s8 + $0x18] sm:$0xff]  ;;  %v931_v59 = vld [vmem:[%s3303_s8 + $0x20] sm:$0xff]  ;;  %v932_v62 = vld [vmem:[%s3303_s8 + $0x28] sm:$0xff] }
  0x42   : > { %786 = vadd.xlane.f32.xlu0 %v785_v3  ;;  %s3299_s26 = smov %s3298_s30  ;;  %v2433_v14 = vld [vmem:[%s3298_s30 + $0x8] sm:$0xff]   ;;  %2327 = vmatpush3.bf16.msra.mxu1 %v2436_v18  ;;  %s3305_s30 = sld [smem:[#allocation20_spill]] }
  0x43   : > { %2317 = vmatpush3.bf16.msra.mxu0 %v2433_v14  ;;  %v2435_v17 = vld [vmem:[%s3299_s26] sm:$0xff]   ;;  %2340 = vmatprep.subr.bf16.mxu1 %v2588_v16  ;;  %v937_v14 = vld [vmem:[%s3303_s8 + $0x50] sm:$0xff] }
  0x44   : > { %2318 = vmatprep.subr.bf16.mxu0 %v2588_v16 }
  0x47   : > { %2319 = vmatpush3.bf16.msra.mxu0 %v2435_v17 }
  0x48   : > { %2332 = vmatprep.subr.bf16.mxu0 %v2588_v16 }
  0xc7   : > { %v784_v4 = vpop.xlane.xlu0 %783 }
  0xc8   : > { %v789_v5 = vmul.f32 0.03125, %v784_v4 }
  0xca   : > { %v791_v6 = vsub.f32 %v2795_v0, %v789_v5  ;;  %v933_v5 = vld [vmem:[%s3303_s8 + $0x30] sm:$0xff] }
  0xcb   : > { %v787_v7 = vpop.xlane.xlu0 %786 }
  0xcc   : > { %v790_v8 = vmul.f32 0.03125, %v787_v7  ;;  %v793_v9 = vmul.f32 %v791_v6, %v791_v6  ;;  %v934_v7 = vld [vmem:[%s3303_s8 + $0x38] sm:$0xff] }
  0xce   : > { %v792_v10 = vsub.f32 %v2797_v1, %v790_v8  ;;  %v795_v11 = vsel %vm781_vm0, %v793_v9, 0.0  ;;  %v935_v8 = vld [vmem:[%s3303_s8 + $0x40] sm:$0xff]  ;;  %v936_v9 = vld [vmem:[%s3303_s8 + $0x48] sm:$0xff] }
  0xcf   : > { %796 = vadd.xlane.f32.xlu1 %v795_v11 }
  0xd0   : > { %v794_v12 = vmul.f32 %v792_v10, %v792_v10 }
  0xd2   : > { %v798_v13 = vsel %vm781_vm0, %v794_v12, 0.0 }
  0xd3   : > { %799 = vadd.xlane.f32.xlu1 %v798_v13 }
 0x158   : > { %v797_v19 = vpop.xlane.xlu1 %796 }
 0x159   : > { %v801_v20 = vmul.f32 0.03125, %v797_v19 }
 0x15b   : > { %v803_v21 = vadd.f32 1e-05, %v801_v20  ;;  %v938_v20 = vld [vmem:[%s3303_s8 + $0x58] sm:$0xff] }
 0x15c   : > { %v800_v22 = vpop.xlane.xlu1 %799 }
 0x15d   : > { %2449 = vrsqrt.f32 %v803_v21  ;;  %v802_v23 = vmul.f32 0.03125, %v800_v22  ;;  %v939_v21 = vld [vmem:[%s3303_s8 + $0x60] sm:$0xff] }
 0x15f   : > { %v804_v24 = vadd.f32 1e-05, %v802_v23 }
 0x161   : > { %2451 = vrsqrt.f32 %v804_v24 }
 0x16a   : > { %v2450_v30 = vpop.eup %2449 }
 0x16b   : > { %v807_v32 = vmul.f32 %v2450_v30, %v791_v6  ;;  %v940_v30 = vld [vmem:[%s3303_s8 + $0x68] sm:$0xff] }
 0x16d   : > { %v816_v35 = vmul.f32 %v2244_v31, %v807_v32 }
 0x16e   : > { %v2452_v36 = vpop.eup %2451 }
 0x16f   : > { %v825_v37 = vadd.f32 %v2245_v33, %v816_v35  ;;  %v808_v38 = vmul.f32 %v2452_v36, %v792_v10  ;;  %v941_v36 = vld [vmem:[%s3303_s8 + $0x70] sm:$0xff] }
 0x171   : > { %v829_v39 = vcombine.high %v825_v37, %v825_v37  ;;  %v836_v40 = vrot.slane %v825_v37, %v2835_v34  ;;  %v817_v45 = vmul.f32 %v2244_v31, %v808_v38 }
 0x173   : > { %v843_v42 = vrot.slane %v829_v39, %v2835_v34  ;;  %v844_v43 = vcombine.high %v836_v40, %v836_v40  ;;  %v852_v44 = vrot.slane %v836_v40, %v2835_v34  ;;  %v826_v61 = vadd.f32 %v2245_v33, %v817_v45 }
 0x175   : > { %v845_v46 = vcombine.high %v843_v42, %v843_v42  ;;  %v859_v47 = vrot.slane %v843_v42, %v2835_v34  ;;  %v866_v48 = vrot.slane %v844_v43, %v2835_v34  ;;  %v874_v49 = vcombine.high %v852_v44, %v852_v44 }
 0x176   : > { %v962_v50 = vrot.slane %v852_v44, %v2838_v41  ;;  %v878_v18 = vcombine.high %v826_v61, %v826_v61  ;;  %v885_v19 = vrot.slane %v826_v61, %v2835_v34 }
 0x177   : > { %v873_v53 = vrot.slane %v845_v46, %v2835_v34  ;;  %v876_v54 = vcombine.high %v866_v48, %v866_v48  ;;  %v966_v55 = vrot.slane %v866_v48, %v2838_v41  ;;  %v970_v56 = vrot.slane %v874_v49, %v2838_v41  ;;  %v942_v46 = vld [vmem:[%s3303_s8 + $0x78] sm:$0xff] }
 0x178   : > { %v875_v60 = vcombine.high %v859_v47, %v859_v47  ;;  %v1039_v3 = vmul.f32 %v962_v50, %v927_v51  ;;  %v978_v6 = vrot.slane %v859_v47, %v2838_v41  ;;  %v1040_v11 = vmul.f32 %v962_v50, %v928_v57  ;;  %v943_v57 = vld [vmem:[%s3303_s8 + $0x80] sm:$0xff] }
 0x179   : > { %v877_v63 = vcombine.high %v873_v53, %v873_v53  ;;  %v974_v2 = vrot.slane %v876_v54, %v2838_v41  ;;  %v1041_v4 = vmul.f32 %v966_v55, %v929_v52  ;;  %v982_v10 = vrot.slane %v873_v53, %v2838_v41 }
 0x17a   : > { %v1042_v12 = vmul.f32 %v966_v55, %v930_v58  ;;  %v1043_v13 = vmul.f32 %v970_v56, %v931_v59  ;;  %v986_v15 = vrot.slane %v875_v60, %v2838_v41  ;;  %v1044_v17 = vmul.f32 %v970_v56, %v932_v62 }
 0x17b   : > { %v990_v22 = vrot.slane %v877_v63, %v2838_v41  ;;  %v1045_v23 = vmul.f32 %v974_v2, %v933_v5  ;;  %v1071_v24 = vsel %vm781_vm0, %v1039_v3, 0.0  ;;  %v1072_v25 = vsel %vm781_vm0, %v1041_v4, 0.0  ;;  %v944_v4 = vld [vmem:[%s3303_s8 + $0x88] sm:$0xff] }
 0x17c   : > { %v1046_v26 = vmul.f32 %v974_v2, %v934_v7  ;;  %v1047_v27 = vmul.f32 %v978_v6, %v935_v8  ;;  %v1048_v28 = vmul.f32 %v978_v6, %v936_v9  ;;  %v1073_v29 = vadd.f32 %v1072_v25, %v1071_v24  ;;  %v945_v9 = vld [vmem:[%s3303_s8 + $0x90] sm:$0xff] }
 0x17d   : > { %v1049_v31 = vmul.f32 %v982_v10, %v937_v14  ;;  %v1074_v32 = vsel %vm781_vm0, %v1043_v13, 0.0  ;;  %v1102_v33 = vsel %vm781_vm0, %v1040_v11, 0.0  ;;  %v1103_v35 = vsel %vm781_vm0, %v1042_v12, 0.0 }
 0x17e   : > { %v1050_v37 = vmul.f32 %v982_v10, %v938_v20  ;;  %v1051_v38 = vmul.f32 %v986_v15, %v939_v21  ;;  %v1075_v39 = vadd.f32 %v1074_v32, %v1073_v29  ;;  %v1104_v40 = vadd.f32 %v1103_v35, %v1102_v33 }
 0x17f   : > { %v1076_v42 = vsel %vm781_vm0, %v1045_v23, 0.0  ;;  %v1105_v43 = vsel %vm781_vm0, %v1044_v17, 0.0  ;;  %v892_v44 = vrot.slane %v878_v18, %v2835_v34  ;;  %v893_v45 = vcombine.high %v885_v19, %v885_v19  ;;  %v946_v17 = vld [vmem:[%s3303_s8 + $0x98] sm:$0xff]  ;;  %v947_v18 = vld [vmem:[%s3303_s8 + $0xa0] sm:$0xff] }
 0x180   : > { %v1052_v47 = vmul.f32 %v986_v15, %v940_v30  ;;  %v1077_v48 = vadd.f32 %v1076_v42, %v1075_v39  ;;  %v1106_v49 = vadd.f32 %v1105_v43, %v1104_v40  ;;  %v901_v50 = vrot.slane %v885_v19, %v2835_v34  ;;  %v950_v40 = vld [vmem:[%s3303_s8 + $0xb8] sm:$0xff]  ;;  %v951_v42 = vld [vmem:[%s3303_s8 + $0xc0] sm:$0xff] }
 0x181   : > { %v1053_v51 = vmul.f32 %v990_v22, %v941_v36  ;;  %v1078_v52 = vsel %vm781_vm0, %v1047_v27, 0.0  ;;  %v1107_v53 = vsel %vm781_vm0, %v1046_v26, 0.0  ;;  %v915_v54 = vrot.slane %v893_v45, %v2835_v34 }
 0x182   : > { %v1079_v55 = vadd.f32 %v1078_v52, %v1077_v48  ;;  %v1108_v56 = vadd.f32 %v1107_v53, %v1106_v49  ;;  %v923_v58 = vcombine.high %v901_v50, %v901_v50  ;;  %v994_v59 = vrot.slane %v901_v50, %v2838_v41  ;;  %v953_v48 = vld [vmem:[%s3303_s8 + $0xd0] sm:$0xff] }
 0x183   : > { %v1054_v60 = vmul.f32 %v990_v22, %v942_v46  ;;  %v1080_v61 = vsel %vm781_vm0, %v1049_v31, 0.0  ;;  %v1109_v62 = vsel %vm781_vm0, %v1048_v28, 0.0  ;;  %v894_v63 = vcombine.high %v892_v44, %v892_v44  ;;  %v948_v22 = vld [vmem:[%s3303_s8 + $0xa8] sm:$0xff]  ;;  %v949_v31 = vld [vmem:[%s3303_s8 + $0xb0] sm:$0xff] }
 0x184   : > { %v1081_v2 = vadd.f32 %v1080_v61, %v1079_v55  ;;  %v1110_v3 = vadd.f32 %v1109_v62, %v1108_v56  ;;  %v925_v5 = vcombine.high %v915_v54, %v915_v54  ;;  %v998_v6 = vrot.slane %v915_v54, %v2838_v41  ;;  %v954_v55 = vld [vmem:[%s3303_s8 + $0xd8] sm:$0xff]  ;;  %v955_v56 = vld [vmem:[%s3303_s8 + $0xe0] sm:$0xff] }
 0x185   : > { %v1082_v7 = vsel %vm781_vm0, %v1051_v38, 0.0  ;;  %v1111_v8 = vsel %vm781_vm0, %v1050_v37, 0.0  ;;  %v908_v10 = vrot.slane %v892_v44, %v2835_v34  ;;  %v1055_v11 = vmul.f32 %v994_v59, %v943_v57 }
 0x186   : > { %v1112_v12 = vadd.f32 %v1111_v8, %v1110_v3  ;;  %v1083_v13 = vadd.f32 %v1082_v7, %v1081_v2  ;;  %v1002_v14 = vrot.slane %v923_v58, %v2838_v41  ;;  %v1113_v15 = vsel %vm781_vm0, %v1052_v47, 0.0  ;;  %v952_v47 = vld [vmem:[%s3303_s8 + $0xc8] sm:$0xff]  ;;  %v957_v3 = vld [vmem:[%s3303_s8 + $0xf0] sm:$0xff] }
 0x187   : > { %v1084_v19 = vsel %vm781_vm0, %v1053_v51, 0.0  ;;  %v1056_v20 = vmul.f32 %v994_v59, %v944_v4  ;;  %v922_v21 = vrot.slane %v894_v63, %v2835_v34  ;;  %v1006_v25 = vrot.slane %v925_v5, %v2838_v41  ;;  %v956_v2 = vld [vmem:[%s3303_s8 + $0xe8] sm:$0xff] }
 0x188   : > { %v1085_v23 = vadd.f32 %v1084_v19, %v1083_v13  ;;  %v1114_v24 = vadd.f32 %v1113_v15, %v1112_v12  ;;  %v1057_v26 = vmul.f32 %v998_v6, %v945_v9  ;;  %v1115_v27 = vsel %vm781_vm0, %v1054_v60, 0.0 }
 0x189   : > { %v1010_v28 = vrot.slane %v908_v10, %v2838_v41  ;;  %v1086_v29 = vsel %vm781_vm0, %v1055_v11, 0.0  ;;  %v924_v30 = vcombine.high %v908_v10, %v908_v10  ;;  %v1058_v33 = vmul.f32 %v998_v6, %v946_v17  ;;  %v958_v10 = vld [vmem:[%s3303_s8 + $0xf8] sm:$0xff]  ;;  %s2523_s8 = sshll.u32 %s2591_s7, 4  ;;  %s2524_s8 = int_to_ptr.vmem [resolvable:$false] %s2523_s8 }
 0x18a   : > { %v1116_v32 = vadd.f32 %v1115_v27, %v1114_v24  ;;  %v1059_v35 = vmul.f32 %v1002_v14, %v947_v18  ;;  %v1087_v36 = vadd.f32 %v1086_v29, %v1085_v23  ;;  %v1060_v37 = vmul.f32 %v1002_v14, %v948_v22  ;;  %s2525_s9 = scalar_lea.vmem %s2524_s8, 512 }
 0x18b   : > { %v1117_v38 = vsel %vm781_vm0, %v1056_v20, 0.0  ;;  %v926_v39 = vcombine.high %v922_v21, %v922_v21  ;;  %v1014_v44 = vrot.slane %v922_v21, %v2838_v41  ;;  %v1061_v45 = vmul.f32 %v1006_v25, %v949_v31 }
 0x18c   : > { %v1118_v43 = vadd.f32 %v1117_v38, %v1116_v32  ;;  %v1088_v46 = vsel %vm781_vm0, %v1057_v26, 0.0  ;;  %v1018_v49 = vrot.slane %v924_v30, %v2838_v41  ;;  %v1062_v51 = vmul.f32 %v1006_v25, %v950_v40 }
 0x18d   : > { %v1089_v50 = vadd.f32 %v1088_v46, %v1087_v36  ;;  %v1063_v52 = vmul.f32 %v1010_v28, %v951_v42  ;;  %v1090_v53 = vsel %vm781_vm0, %v1059_v35, 0.0  ;;  %v1119_v54 = vsel %vm781_vm0, %v1058_v33, 0.0 }
 0x18e   : > { %v1022_v57 = vrot.slane %v926_v39, %v2838_v41  ;;  %v1120_v59 = vadd.f32 %v1119_v54, %v1118_v43  ;;  %v1064_v60 = vmul.f32 %v1010_v28, %v952_v47  ;;  %v1065_v61 = vmul.f32 %v1014_v44, %v953_v48 }
 0x18f   : > { %v1091_v58 = vadd.f32 %v1090_v53, %v1089_v50  ;;  %v1092_v62 = vsel %vm781_vm0, %v1061_v45, 0.0  ;;  %v1121_v63 = vsel %vm781_vm0, %v1060_v37, 0.0  ;;  %v1066_v6 = vmul.f32 %v1014_v44, %v954_v55 }
 0x190   : > { %v1122_v5 = vadd.f32 %v1121_v63, %v1120_v59  ;;  %v1067_v7 = vmul.f32 %v1018_v49, %v955_v56  ;;  %v1094_v8 = vsel %vm781_vm0, %v1063_v52, 0.0  ;;  %v1123_v9 = vsel %vm781_vm0, %v1062_v51, 0.0  ;;  %v2250_v52 = vld [vmem:[%s3304_s3] ss:$0 sm:$0xff] }
 0x191   : > { %v1093_v4 = vadd.f32 %v1092_v62, %v1091_v58  ;;  %v1068_v13 = vmul.f32 %v1018_v49, %v956_v2  ;;  %v1069_v14 = vmul.f32 %v1022_v57, %v957_v3  ;;  %v1096_v15 = vsel %vm781_vm0, %v1065_v61, 0.0 }
 0x192   : > { %v1124_v12 = vadd.f32 %v1123_v9, %v1122_v5  ;;  %v1125_v17 = vsel %vm781_vm0, %v1064_v60, 0.0  ;;  %v1070_v20 = vmul.f32 %v1022_v57, %v958_v10  ;;  %v1098_v21 = vsel %vm781_vm0, %v1067_v7, 0.0  ;;  %v2246_v7 = vld [vmem:[%s3305_s30] ss:$0 sm:$0xff] }
 0x193   : > { %v1095_v11 = vadd.f32 %v1094_v8, %v1093_v4  ;;  %v1127_v22 = vsel %vm781_vm0, %v1066_v6, 0.0  ;;  %v1100_v25 = vsel %vm781_vm0, %v1069_v14, 0.0  ;;  %v1129_v26 = vsel %vm781_vm0, %v1068_v13, 0.0 }
 0x194   : > { %v1126_v19 = vadd.f32 %v1125_v17, %v1124_v12  ;;  %v1131_v29 = vsel %vm781_vm0, %v1070_v20, 0.0 }
 0x195   : > { %v1097_v18 = vadd.f32 %v1096_v15, %v1095_v11 }
 0x196   : > { %v1128_v24 = vadd.f32 %v1127_v22, %v1126_v19 }
 0x197   : > { %v1099_v23 = vadd.f32 %v1098_v21, %v1097_v18 }
 0x198   : > { %v1130_v28 = vadd.f32 %v1129_v26, %v1128_v24 }
 0x199   : > { %v1101_v27 = vadd.f32 %v1100_v25, %v1099_v23 }
 0x19a   : > { %v1132_v30 = vadd.f32 %v1131_v29, %v1130_v28  ;;  %v2438_v28 = vld [vmem:[%s3250_s11 + $0x8] sm:$0xff]   ;;  %v2439_v29 = vld [vmem:[%s3251_s12] sm:$0xff]  }
 0x19b   : > { %v1133_v31 = vmul.f32 %v1101_v27, %v1101_v27 }
 0x19c   : > { %v1134_v32 = vmul.f32 %v1132_v30, %v1132_v30 }
 0x19d   : > { %v1135_v33 = vmul.f32 %v1133_v31, %v1101_v27 }
 0x19e   : > { %v1136_v35 = vmul.f32 %v1134_v32, %v1132_v30 }
 0x19f   : > { %v1137_v36 = vmul.f32 0.044715, %v1135_v33 }
 0x1a0   : > { %v1138_v37 = vmul.f32 0.044715, %v1136_v35 }
 0x1a1   : > { %v1139_v38 = vadd.f32 %v1137_v36, %v1101_v27 }
 0x1a2   : > { %v1140_v39 = vadd.f32 %v1138_v37, %v1132_v30 }
 0x1a3   : > { %v1141_v40 = vmul.f32 0.7978846, %v1139_v38 }
 0x1a4   : > { %v1142_v42 = vmul.f32 0.7978846, %v1140_v39  ;;  %v2256_v39 = vld [vmem:[%s3306_s28] ss:$0 sm:$0xff]  ;;  %s770_s28 = sand.u32 1, %s2575_s2  }
 0x1a5   : > { %2453 = vtanh.f32 %v1141_v40  ;;  %s2241_s0 = sshll.u32 %s770_s28, 4 }
 0x1a6   : > { %2455 = vtanh.f32 %v1142_v42  ;;  %v2257_v42 = vld [vmem:[%s3307_s5] ss:$0 sm:$0xff]  ;;  %s772_s3 = scalar_lea.vmem [#allocation5], %s2241_s0  ;;  %s3199_s5 = scalar_lea.sflag [#allocation4], %s770_s28 }
 0x1a7   : > { %s2161_s29 = sshll.u32 %s772_s3, 4  ;;  %s3192_s29 = int_to_ptr.vmem [resolvable:$true] %s2161_s29 }
 0x1a8   : > { %s2519_s0 = scalar_lea.vmem %s3192_s29, 256  ;;  %p2526_p11 = scmp.lt.s32.totalorder %s3192_s29, %s2524_s8 }
 0x1a9   : > { %p2520_p6 = scmp.ne.s32.totalorder %s3192_s29, %s2519_s0  ;;  %p2527_p12 = scmp.lt.s32.totalorder %s2525_s9, %s2519_s0 }
 0x1ab   : > { %p2521_p9 = pnand %p2520_p6, %p2762_p5  ;;  %p2528_p13 = por %p2527_p12, %p2526_p11 }
 0x1ad   : > { %p2522_p10 = pneg %p2521_p9 }
 0x1af   : > { %p2529_p0 = pnand %p2528_p13, %p2522_p10 }
 0x1b2   : > { %v2454_v43 = vpop.eup %2453 }
 0x1b3   : > { %v1145_v44 = vadd.f32 1.0, %v2454_v43  ;;  %v2456_v45 = vpop.eup %2455 }
 0x1b4   : > { %v1146_v46 = vadd.f32 1.0, %v2456_v45 }
 0x1b5   : > { %v1147_v47 = vmul.f32 0.5, %v1145_v44 }
 0x1b6   : > { %v1148_v48 = vmul.f32 0.5, %v1146_v46 }
 0x1b7   : > { %v1149_v49 = vmul.f32 %v1147_v47, %v1101_v27  ;;  %v2437_v27 = vld [vmem:[%s3251_s12 + $0x8] sm:$0xff]  }
 0x1b8   : > { %v1150_v50 = vmul.f32 %v1148_v48, %v1132_v30  ;;  %v2440_v30 = vld [vmem:[%s3250_s11] sm:$0xff]  }
 0x1ba   : > { %v1151_v51 = vpack.c.bf16 %v1150_v50, %v1149_v49 }
 0x1bc   : > { %2321 = vmatmul.mubr.msk.bf16.vlgmr.msra.gmra.mxu0 %vm781_vm0, %v1151_v51  ;;  %2329 = vmatmul.mubr.msk.bf16.vlgmr.msra.gmra.mxu1 %vm781_vm0, %v1151_v51 }
 0x1bd   : > { %2336 = vmatprep.mubr.msk.bf16.mxu0 %vm2589_vm1, %v2588_v16  ;;  %2344 = vmatprep.mubr.msk.bf16.mxu1 %vm2589_vm1, %v2588_v16 }
 0x1be   : > { %2341 = vmatpush3.bf16.msra.mxu1 %v2437_v27  ;;  %2333 = vmatpush3.bf16.msra.mxu0 %v2438_v28 }
 0x1bf   : > { %2342 = vmatprep.subr.bf16.mxu1 %v2588_v16  ;;  %2334 = vmatprep.subr.bf16.mxu0 %v2588_v16 }
 0x1c2   : > { %2343 = vmatpush3.bf16.msra.mxu1 %v2439_v29  ;;  %2335 = vmatpush3.bf16.msra.mxu0 %v2440_v30  ;;  %v1455_v29 = vld [vmem:[#allocation2 + $0x60] sm:$0xff]  ;;  %v1456_v30 = vld [vmem:[#allocation2 + $0x68] sm:$0xff] }
 0x1c3   : > { %2348 = vmatprep.subr.bf16.mxu0 %v2588_v16  ;;  %2356 = vmatprep.subr.bf16.mxu1 %v2588_v16 }
 0x27c   : > { %v1212_v53 = vpop.f32.mrf.mxu0  ;;  %v1276_v54 = vpop.f32.mrf.mxu1 }
 0x27d   : > { %v1277_v55 = vadd.f32 %v2250_v52, %v1276_v54  ;;  %v1213_v8 = vadd.f32 %v2246_v7, %v1212_v53 }
 0x27e   : > { %v2322_v56 = vpop.f32.mrf.mxu0  ;;  %v2330_v57 = vpop.f32.mrf.mxu1 }
 0x27f   : > { %v2254_v58 = vmul.f32 -1.442695, %v1277_v55 }
 0x280   : > { %v1215_v59 = vpop.f32.mrf.mxu0  ;;  %v1279_v60 = vpop.f32.mrf.mxu1 }
 0x281   : > { %2457 = vpow2.f32 %v2254_v58  ;;  %v1280_v61 = vadd.f32 %v2250_v52, %v1279_v60  ;;  %v1216_v11 = vadd.f32 %v2246_v7, %v1215_v59  ;;  %v1443_v58 = vld [vmem:[#allocation2] sm:$0xff]  ;;  %v1445_v59 = vld [vmem:[#allocation2 + $0x10] sm:$0xff] }
 0x282   : > { %v2323_v62 = vpop.f32.mrf.mxu0  ;;  %v2331_v63 = vpop.f32.mrf.mxu1 }
 0x283   : > { %v2255_v2 = vmul.f32 -1.442695, %v1280_v61 }
 0x285   : > { %2459 = vpow2.f32 %v2255_v2 }
 0x28e   : > { %v2458_v3 = vpop.eup %2457 }
 0x28f   : > { %v1289_v4 = vadd.f32 1.0, %v2458_v3  ;;  %v1444_v3 = vld [vmem:[#allocation2 + $0x8] sm:$0xff] }
 0x291   : > { %2461 = vrcp.f32 %v1289_v4  ;;  %v1446_v4 = vld [vmem:[#allocation2 + $0x18] sm:$0xff] }
 0x292   : > { %v2460_v5 = vpop.eup %2459 }
 0x293   : > { %v1290_v6 = vadd.f32 1.0, %v2460_v5  ;;  %v1447_v5 = vld [vmem:[#allocation2 + $0x20] sm:$0xff] }
 0x295   : > { %2463 = vrcp.f32 %v1290_v6 }
 0x29e   : > { %v2462_v9 = vpop.eup %2461 }
 0x29f   : > { %v1295_v10 = vmul.f32 %v2462_v9, %v1213_v8  ;;  %v1448_v8 = vld [vmem:[#allocation2 + $0x28] sm:$0xff] }
 0x2a1   : > { %v3008_v12 = vadd.f32 %v1295_v10, %v2795_v0 }
 0x2a2   : > { %v2464_v13 = vpop.eup %2463 }
 0x2a3   : > { %v1299_v14 = vsel %vm781_vm0, %v3008_v12, 0.0  ;;  %v1296_v15 = vmul.f32 %v2464_v13, %v1216_v11  ;;  %v1449_v13 = vld [vmem:[#allocation2 + $0x30] sm:$0xff] }
 0x2a4   : > { %1300 = vadd.xlane.f32.xlu0 %v1299_v14  ;;  %v1450_v14 = vld [vmem:[#allocation2 + $0x38] sm:$0xff] }
 0x2a5   : > { %v3013_v17 = vadd.f32 %v1296_v15, %v2797_v1 }
 0x2a7   : > { %v1302_v18 = vsel %vm781_vm0, %v3013_v17, 0.0 }
 0x2a8   : > { %1303 = vadd.xlane.f32.xlu1 %v1302_v18 }
 0x32d   : > { %v1301_v19 = vpop.xlane.xlu0 %1300 }
 0x32e   : > { %v1305_v20 = vmul.f32 0.03125, %v1301_v19  ;;  %v1451_v19 = vld [vmem:[#allocation2 + $0x40] sm:$0xff] }
 0x330   : > { %v1307_v21 = vsub.f32 %v3008_v12, %v1305_v20  ;;  %v1452_v20 = vld [vmem:[#allocation2 + $0x48] sm:$0xff] }
 0x331   : > { %v1304_v22 = vpop.xlane.xlu1 %1303 }
 0x332   : > { %v1306_v0 = vmul.f32 0.03125, %v1304_v22  ;;  %v1309_v23 = vmul.f32 %v1307_v21, %v1307_v21 }
 0x334   : > { %v1308_v24 = vsub.f32 %v3013_v17, %v1306_v0  ;;  %v1311_v25 = vsel %vm781_vm0, %v1309_v23, 0.0 }
 0x335   : > { %1312 = vadd.xlane.f32.xlu0 %v1311_v25  ;;  %v1454_v25 = vld [vmem:[#allocation2 + $0x58] sm:$0xff] }
 0x336   : > { %v1310_v26 = vmul.f32 %v1308_v24, %v1308_v24 }
 0x338   : > { %v1314_v1 = vsel %vm781_vm0, %v1310_v26, 0.0 }
 0x339   : > { %1315 = vadd.xlane.f32.xlu1 %v1314_v1 }
 0x3be   : > { %v1313_v31 = vpop.xlane.xlu0 %1312 }
 0x3bf   : > { %v1317_v32 = vmul.f32 0.03125, %v1313_v31 }
 0x3c1   : > { %v1319_v33 = vadd.f32 1e-05, %v1317_v32 }
 0x3c2   : > { %v1316_v35 = vpop.xlane.xlu1 %1315 }
 0x3c3   : > { %2465 = vrsqrt.f32 %v1319_v33  ;;  %v1318_v36 = vmul.f32 0.03125, %v1316_v35 }
 0x3c5   : > { %v1320_v37 = vadd.f32 1e-05, %v1318_v36 }
 0x3c7   : > { %2467 = vrsqrt.f32 %v1320_v37 }
 0x3d0   : > { %v2466_v38 = vpop.eup %2465 }
 0x3d1   : > { %v1323_v40 = vmul.f32 %v2466_v38, %v1307_v21  ;;  %v1453_v21 = vld [vmem:[#allocation2 + $0x50] sm:$0xff] }
 0x3d3   : > { %v1332_v43 = vmul.f32 %v2256_v39, %v1323_v40  ;;  %v1457_v40 = vld [vmem:[#allocation2 + $0x70] sm:$0xff] }
 0x3d4   : > { %v2468_v44 = vpop.eup %2467 }
 0x3d5   : > { %v1341_v45 = vadd.f32 %v2257_v42, %v1332_v43  ;;  %v1324_v46 = vmul.f32 %v2468_v44, %v1308_v24 }
 0x3d7   : > { %v1345_v47 = vcombine.high %v1341_v45, %v1341_v45  ;;  %v1352_v48 = vrot.slane %v1341_v45, %v2835_v34  ;;  %v1333_v52 = vmul.f32 %v2256_v39, %v1324_v46 }
 0x3d9   : > { %v1359_v49 = vrot.slane %v1345_v47, %v2835_v34  ;;  %v1360_v50 = vcombine.high %v1352_v48, %v1352_v48  ;;  %v1368_v51 = vrot.slane %v1352_v48, %v2835_v34  ;;  %v1342_v2 = vadd.f32 %v2257_v42, %v1333_v52 }
 0x3db   : > { %v1361_v53 = vcombine.high %v1359_v49, %v1359_v49  ;;  %v1375_v54 = vrot.slane %v1359_v49, %v2835_v34  ;;  %v1382_v55 = vrot.slane %v1360_v50, %v2835_v34  ;;  %v1390_v56 = vcombine.high %v1368_v51, %v1368_v51 }
 0x3dc   : > { %v1478_v57 = vrot.slane %v1368_v51, %v2838_v41  ;;  %v1394_v24 = vcombine.high %v1342_v2, %v1342_v2  ;;  %v1401_v28 = vrot.slane %v1342_v2, %v2835_v34 }
 0x3dd   : > { %v1389_v60 = vrot.slane %v1361_v53, %v2835_v34  ;;  %v1392_v61 = vcombine.high %v1382_v55, %v1382_v55  ;;  %v1482_v62 = vrot.slane %v1382_v55, %v2838_v41  ;;  %v1486_v63 = vrot.slane %v1390_v56, %v2838_v41 }
 0x3de   : > { %v1391_v6 = vcombine.high %v1375_v54, %v1375_v54  ;;  %v1555_v10 = vmul.f32 %v1478_v57, %v1443_v58  ;;  %v1494_v15 = vrot.slane %v1375_v54, %v2838_v41  ;;  %v1556_v22 = vmul.f32 %v1478_v57, %v1444_v3  ;;  %v1458_v58 = vld [vmem:[#allocation2 + $0x78] sm:$0xff]  ;;  %v1459_v3 = vld [vmem:[#allocation2 + $0x80] sm:$0xff] }
 0x3df   : > { %v1393_v7 = vcombine.high %v1389_v60, %v1389_v60  ;;  %v1490_v9 = vrot.slane %v1392_v61, %v2838_v41  ;;  %v1557_v11 = vmul.f32 %v1482_v62, %v1445_v59  ;;  %v1498_v18 = vrot.slane %v1389_v60, %v2838_v41 }
 0x3e0   : > { %v1558_v0 = vmul.f32 %v1482_v62, %v1446_v4  ;;  %v1559_v23 = vmul.f32 %v1486_v63, %v1447_v5  ;;  %v1502_v26 = vrot.slane %v1391_v6, %v2838_v41  ;;  %v1560_v27 = vmul.f32 %v1486_v63, %v1448_v8 }
 0x3e1   : > { %v1506_v1 = vrot.slane %v1393_v7, %v2838_v41  ;;  %v1561_v31 = vmul.f32 %v1490_v9, %v1449_v13  ;;  %v1562_v32 = vmul.f32 %v1490_v9, %v1450_v14  ;;  %v1587_v33 = vsel %vm781_vm0, %v1555_v10, 0.0  ;;  %v1460_v14 = vld [vmem:[#allocation2 + $0x88] sm:$0xff] }
 0x3e2   : > { %v1588_v35 = vsel %vm781_vm0, %v1557_v11, 0.0  ;;  %v1563_v36 = vmul.f32 %v1494_v15, %v1451_v19  ;;  %v1564_v37 = vmul.f32 %v1494_v15, %v1452_v20  ;;  %v1565_v38 = vmul.f32 %v1498_v18, %v1453_v21  ;;  %v1461_v15 = vld [vmem:[#allocation2 + $0x90] sm:$0xff] }
 0x3e3   : > { %v1589_v39 = vadd.f32 %v1588_v35, %v1587_v33  ;;  %v1566_v42 = vmul.f32 %v1498_v18, %v1454_v25  ;;  %v1590_v43 = vsel %vm781_vm0, %v1559_v23, 0.0  ;;  %v1618_v44 = vsel %vm781_vm0, %v1556_v22, 0.0  ;;  %v1463_v25 = vld [vmem:[#allocation2 + $0xa0] sm:$0xff] }
 0x3e4   : > { %v1619_v45 = vsel %vm781_vm0, %v1558_v0, 0.0  ;;  %v1567_v46 = vmul.f32 %v1502_v26, %v1455_v29  ;;  %v1568_v47 = vmul.f32 %v1502_v26, %v1456_v30  ;;  %v1592_v50 = vsel %vm781_vm0, %v1561_v31, 0.0 }
 0x3e5   : > { %v1591_v48 = vadd.f32 %v1590_v43, %v1589_v39  ;;  %v1620_v49 = vadd.f32 %v1619_v45, %v1618_v44  ;;  %v1621_v51 = vsel %vm781_vm0, %v1560_v27, 0.0  ;;  %v1408_v52 = vrot.slane %v1394_v24, %v2835_v34  ;;  %v1462_v24 = vld [vmem:[#allocation2 + $0x98] sm:$0xff]  ;;  %v1464_v27 = vld [vmem:[#allocation2 + $0xa8] sm:$0xff]  ;;  %v1467_v43 = vld [vmem:[#allocation2 + $0xc0] sm:$0xff] }
 0x3e6   : > { %v1409_v53 = vcombine.high %v1401_v28, %v1401_v28  ;;  %v1569_v54 = vmul.f32 %v1506_v1, %v1457_v40  ;;  %v1417_v57 = vrot.slane %v1401_v28, %v2835_v34  ;;  %v1594_v59 = vsel %vm781_vm0, %v1563_v36, 0.0 }
 0x3e7   : > { %v1593_v55 = vadd.f32 %v1592_v50, %v1591_v48  ;;  %v1622_v56 = vadd.f32 %v1621_v51, %v1620_v49  ;;  %v1623_v60 = vsel %vm781_vm0, %v1562_v32, 0.0  ;;  %v1410_v61 = vcombine.high %v1408_v52, %v1408_v52  ;;  %v1465_v32 = vld [vmem:[#allocation2 + $0xb0] sm:$0xff]  ;;  %v1468_v48 = vld [vmem:[#allocation2 + $0xc8] sm:$0xff] }
 0x3e8   : > { %v1431_v62 = vrot.slane %v1409_v53, %v2835_v34  ;;  %v1439_v4 = vcombine.high %v1417_v57, %v1417_v57  ;;  %v1510_v5 = vrot.slane %v1417_v57, %v2838_v41  ;;  %v1596_v6 = vsel %vm781_vm0, %v1565_v38, 0.0  ;;  %v1466_v38 = vld [vmem:[#allocation2 + $0xb8] sm:$0xff] }
 0x3e9   : > { %v1595_v63 = vadd.f32 %v1594_v59, %v1593_v55  ;;  %v1624_v2 = vadd.f32 %v1623_v60, %v1622_v56  ;;  %v1625_v7 = vsel %vm781_vm0, %v1564_v37, 0.0  ;;  %v1570_v10 = vmul.f32 %v1506_v1, %v1458_v58  ;;  %v1469_v56 = vld [vmem:[#allocation2 + $0xd0] sm:$0xff] }
 0x3ea   : > { %v1441_v8 = vcombine.high %v1431_v62, %v1431_v62  ;;  %v1514_v9 = vrot.slane %v1431_v62, %v2838_v41  ;;  %v1424_v18 = vrot.slane %v1408_v52, %v2835_v34  ;;  %v1598_v19 = vsel %vm781_vm0, %v1567_v46, 0.0 }
 0x3eb   : > { %v1597_v11 = vadd.f32 %v1596_v6, %v1595_v63  ;;  %v1626_v13 = vadd.f32 %v1625_v7, %v1624_v2  ;;  %v1627_v20 = vsel %vm781_vm0, %v1566_v42, 0.0  ;;  %v1518_v21 = vrot.slane %v1439_v4, %v2838_v41  ;;  %v1470_v63 = vld [vmem:[#allocation2 + $0xd8] sm:$0xff]  ;;  %v1471_v2 = vld [vmem:[#allocation2 + $0xe0] sm:$0xff] }
 0x3ec   : > { %v1571_v22 = vmul.f32 %v1510_v5, %v1459_v3  ;;  %v1629_v23 = vsel %vm781_vm0, %v1568_v47, 0.0  ;;  %v1438_v1 = vrot.slane %v1410_v61, %v2835_v34  ;;  %v1600_v28 = vsel %vm781_vm0, %v1569_v54, 0.0 }
 0x3ed   : > { %v1628_v0 = vadd.f32 %v1627_v20, %v1626_v13  ;;  %v1599_v26 = vadd.f32 %v1598_v19, %v1597_v11  ;;  %v1522_v29 = vrot.slane %v1441_v8, %v2838_v41  ;;  %v1572_v30 = vmul.f32 %v1510_v5, %v1460_v14  ;;  %v1472_v8 = vld [vmem:[#allocation2 + $0xe8] sm:$0xff]  ;;  %v1474_v19 = vld [vmem:[#allocation2 + $0xf8] sm:$0xff] }
 0x3ee   : > { %v1573_v31 = vmul.f32 %v1514_v9, %v1461_v15  ;;  %v1631_v36 = vsel %vm781_vm0, %v1570_v10, 0.0  ;;  %v1440_v37 = vcombine.high %v1424_v18, %v1424_v18  ;;  %v1526_v39 = vrot.slane %v1424_v18, %v2838_v41 }
 0x3ef   : > { %v1601_v33 = vadd.f32 %v1600_v28, %v1599_v26  ;;  %v1630_v35 = vadd.f32 %v1629_v23, %v1628_v0  ;;  %v1574_v40 = vmul.f32 %v1514_v9, %v1462_v24  ;;  %v1575_v42 = vmul.f32 %v1518_v21, %v1463_v25  ;;  %v1473_v9 = vld [vmem:[#allocation2 + $0xf0] sm:$0xff] }
 0x3f0   : > { %v1602_v34 = vsel %vm781_vm0, %v1571_v22, 0.0  ;;  %v1530_v45 = vrot.slane %v1438_v1, %v2838_v41  ;;  %v1576_v46 = vmul.f32 %v1518_v21, %v1464_v27  ;;  %v1577_v49 = vmul.f32 %v1522_v29, %v1465_v32 }
 0x3f1   : > { %v1632_v44 = vadd.f32 %v1631_v36, %v1630_v35  ;;  %v1603_v47 = vadd.f32 %v1602_v34, %v1601_v33  ;;  %v1604_v50 = vsel %vm781_vm0, %v1573_v31, 0.0  ;;  %v1633_v51 = vsel %vm781_vm0, %v1572_v30, 0.0 }
 0x3f2   : > { %v1442_v52 = vcombine.high %v1438_v1, %v1438_v1  ;;  %v1578_v53 = vmul.f32 %v1522_v29, %v1466_v38  ;;  %v1579_v57 = vmul.f32 %v1526_v39, %v1467_v43  ;;  %v1606_v58 = vsel %vm781_vm0, %v1575_v42, 0.0 }
 0x3f3   : > { %v1605_v54 = vadd.f32 %v1604_v50, %v1603_v47  ;;  %v1634_v55 = vadd.f32 %v1633_v51, %v1632_v44  ;;  %v1635_v59 = vsel %vm781_vm0, %v1574_v40, 0.0  ;;  %v1534_v60 = vrot.slane %v1440_v37, %v2838_v41 }
 0x3f4   : > { %v1580_v61 = vmul.f32 %v1526_v39, %v1468_v48  ;;  %v1637_v4 = vsel %vm781_vm0, %v1576_v46, 0.0  ;;  %v1538_v5 = vrot.slane %v1442_v52, %v2838_v41  ;;  %v1581_v6 = vmul.f32 %v1530_v45, %v1469_v56  ;;  %v2262_v56 = vld [vmem:[%s3253_s14] ss:$0 sm:$0xff] }
 0x3f5   : > { %v1636_v62 = vadd.f32 %v1635_v59, %v1634_v55  ;;  %v1607_v3 = vadd.f32 %v1606_v58, %v1605_v54  ;;  %v1608_v7 = vsel %vm781_vm0, %v1577_v49, 0.0  ;;  %v1582_v13 = vmul.f32 %v1530_v45, %v1470_v63 }
 0x3f6   : > { %v1583_v14 = vmul.f32 %v1534_v60, %v1471_v2  ;;  %v1610_v15 = vsel %vm781_vm0, %v1579_v57, 0.0  ;;  %v1639_v18 = vsel %vm781_vm0, %v1578_v53, 0.0  ;;  %v1584_v22 = vmul.f32 %v1534_v60, %v1472_v8 }
 0x3f7   : > { %v1609_v10 = vadd.f32 %v1608_v7, %v1607_v3  ;;  %v1638_v11 = vadd.f32 %v1637_v4, %v1636_v62  ;;  %v1585_v0 = vmul.f32 %v1538_v5, %v1473_v9  ;;  %v1612_v41 = vsel %vm781_vm0, %v1581_v6, 0.0 }
 0x3f8   : > { %v1641_v23 = vsel %vm781_vm0, %v1580_v61, 0.0  ;;  %v1586_v26 = vmul.f32 %v1538_v5, %v1474_v19  ;;  %v1614_v1 = vsel %vm781_vm0, %v1583_v14, 0.0  ;;  %v1643_v27 = vsel %vm781_vm0, %v1582_v13, 0.0 }
 0x3f9   : > { %v1611_v20 = vadd.f32 %v1610_v15, %v1609_v10  ;;  %v1640_v21 = vadd.f32 %v1639_v18, %v1638_v11  ;;  %v1616_v30 = vsel %vm781_vm0, %v1585_v0, 0.0  ;;  %v1645_v31 = vsel %vm781_vm0, %v1584_v22, 0.0  ;;  %v2258_v11 = vld [vmem:[%s3252_s13] ss:$0 sm:$0xff] }
 0x3fa   : > { %v1647_v35 = vsel %vm781_vm0, %v1586_v26, 0.0 }
 0x3fb   : > { %v1613_v24 = vadd.f32 %v1612_v41, %v1611_v20  ;;  %v1642_v25 = vadd.f32 %v1641_v23, %v1640_v21 }
 0x3fd   : > { %v1615_v28 = vadd.f32 %v1614_v1, %v1613_v24  ;;  %v1644_v29 = vadd.f32 %v1643_v27, %v1642_v25 }
 0x3ff   : > { %v1617_v32 = vadd.f32 %v1616_v30, %v1615_v28  ;;  %v1646_v33 = vadd.f32 %v1645_v31, %v1644_v29  ;;  %v2441_v30 = vld [vmem:[%s3256_s17 + $0x8] sm:$0xff]   ;;  %v2442_v31 = vld [vmem:[%s3256_s17] sm:$0xff]  }
 0x401   : > { %v1648_v36 = vadd.f32 %v1647_v35, %v1646_v33  ;;  %v1649_v37 = vmul.f32 %v1617_v32, %v1617_v32 }
 0x403   : > { %v1650_v38 = vmul.f32 %v1648_v36, %v1648_v36  ;;  %v1651_v39 = vmul.f32 %v1649_v37, %v1617_v32 }
 0x405   : > { %v1652_v40 = vmul.f32 %v1650_v38, %v1648_v36  ;;  %v1653_v42 = vmul.f32 0.044715, %v1651_v39 }
 0x407   : > { %v1654_v34 = vmul.f32 0.044715, %v1652_v40  ;;  %v1655_v43 = vadd.f32 %v1653_v42, %v1617_v32  ;;  %v2268_v42 = vld [vmem:[%s3254_s15] ss:$0 sm:$0xff] }
 0x409   : > { %v1656_v44 = vadd.f32 %v1654_v34, %v1648_v36  ;;  %v1657_v45 = vmul.f32 0.7978846, %v1655_v43 }
 0x40b   : > { %v1658_v46 = vmul.f32 0.7978846, %v1656_v44  ;;  %2469 = vtanh.f32 %v1657_v45  ;;  %v2269_v45 = vld [vmem:[%s3255_s16] ss:$0 sm:$0xff] }
 0x40d   : > { %2471 = vtanh.f32 %v1658_v46 }
 0x418   : > { %v2470_v47 = vpop.eup %2469 }
 0x419   : > { %v1661_v48 = vadd.f32 1.0, %v2470_v47 }
 0x41a   : > { %v2472_v49 = vpop.eup %2471 }
 0x41b   : > { %v1662_v50 = vadd.f32 1.0, %v2472_v49  ;;  %v1663_v51 = vmul.f32 0.5, %v1661_v48 }
 0x41d   : > { %v1664_v52 = vmul.f32 0.5, %v1662_v50  ;;  %v1665_v53 = vmul.f32 %v1663_v51, %v1617_v32  ;;  %v2443_v50 = vld [vmem:[%s3258_s19 + $0x18] sm:$0xff]   ;;  %v2444_v51 = vld [vmem:[%s3258_s19 + $0x10] sm:$0xff]  }
 0x41f   : > { %v1666_v54 = vmul.f32 %v1664_v52, %v1648_v36  ;;  %v2445_v52 = vld [vmem:[%s3258_s19 + $0x8] sm:$0xff]  }
 0x421   : > { %v1667_v55 = vpack.c.bf16 %v1666_v54, %v1665_v53  ;;  %v2446_v53 = vld [vmem:[%s3258_s19] sm:$0xff]  }
 0x422   : > { %v2270_v54 = vld [vmem:[%s3257_s18] ss:$0 sm:$0xff] }
 0x423   : > { %2337 = vmatmul.mubr.msk.bf16.vlgmr.msra.gmra.mxu0 %vm781_vm0, %v1667_v55  ;;  %2345 = vmatmul.mubr.msk.bf16.vlgmr.msra.gmra.mxu1 %vm781_vm0, %v1667_v55 }
 0x424   : > { %2352 = vmatprep.mubr.msk.bf16.mxu0 %vm2589_vm1, %v2588_v16  ;;  %2364 = vmatprep.mubr.msk.bf16.mxu1 %vm2589_vm1, %v2588_v16 }
 0x425   : > { %2349 = vmatpush3.bf16.msra.mxu0 %v2441_v30  ;;  %2357 = vmatpush3.bf16.msra.mxu1 %v2443_v50 }
 0x426   : > { %2350 = vmatprep.subr.bf16.mxu0 %v2588_v16  ;;  %2358 = vmatprep.subr.bf16.mxu1 %v2588_v16 }
 0x429   : > { %2351 = vmatpush3.bf16.msra.mxu0 %v2442_v31  ;;  %2359 = vmatpush3.bf16.msra.mxu1 %v2444_v51 }
 0x42a   : > { %2368 = vmatprep.subr.bf16.mxu0 %v2588_v16  ;;  %2360 = vmatprep.subr.bf16.mxu1 %v2588_v16 }
 0x42d   : > { %2361 = vmatpush3.bf16.msra.mxu1 %v2445_v52 }
 0x42e   : > { %2362 = vmatprep.subr.bf16.mxu1 %v2588_v16 }
 0x431   : > { %2363 = vmatpush3.bf16.msra.mxu1 %v2446_v53 }
 0x4e3   : > { %v1728_v57 = vpop.f32.mrf.mxu0  ;;  %v1792_v58 = vpop.f32.mrf.mxu1 }
 0x4e4   : > { %v1793_v59 = vadd.f32 %v2262_v56, %v1792_v58  ;;  %v1729_v13 = vadd.f32 %v2258_v11, %v1728_v57 }
 0x4e5   : > { %v2338_v60 = vpop.f32.mrf.mxu0  ;;  %v2346_v61 = vpop.f32.mrf.mxu1 }
 0x4e6   : > { %v2266_v62 = vmul.f32 -1.442695, %v1793_v59 }
 0x4e7   : > { %v1731_v63 = vpop.f32.mrf.mxu0  ;;  %v1795_v2 = vpop.f32.mrf.mxu1 }
 0x4e8   : > { %2473 = vpow2.f32 %v2266_v62  ;;  %v1796_v3 = vadd.f32 %v2262_v56, %v1795_v2  ;;  %v1732_v18 = vadd.f32 %v2258_v11, %v1731_v63 }
 0x4e9   : > { %v2339_v4 = vpop.f32.mrf.mxu0  ;;  %v2347_v5 = vpop.f32.mrf.mxu1 }
 0x4ea   : > { %v2267_v6 = vmul.f32 -1.442695, %v1796_v3 }
 0x4ec   : > { %2475 = vpow2.f32 %v2267_v6 }
 0x4f5   : > { %v2474_v7 = vpop.eup %2473 }
 0x4f6   : > { %v1805_v8 = vadd.f32 1.0, %v2474_v7 }
 0x4f8   : > { %2477 = vrcp.f32 %v1805_v8 }
 0x4f9   : > { %v2476_v9 = vpop.eup %2475 }
 0x4fa   : > { %v1806_v10 = vadd.f32 1.0, %v2476_v9 }
 0x4fc   : > { %2479 = vrcp.f32 %v1806_v10 }
 0x505   : > { %v2478_v14 = vpop.eup %2477 }
 0x506   : > { %v1811_v15 = vmul.f32 %v2478_v14, %v1729_v13 }
 0x508   : > { %v3116_v19 = vadd.f32 %v1811_v15, %v3008_v12 }
 0x509   : > { %v2480_v20 = vpop.eup %2479 }
 0x50a   : > { %v1815_v21 = vsel %vm781_vm0, %v3116_v19, 0.0  ;;  %v1812_v22 = vmul.f32 %v2480_v20, %v1732_v18 }
 0x50b   : > { %1816 = vadd.xlane.f32.xlu0 %v1815_v21 }
 0x50c   : > { %v3121_v0 = vadd.f32 %v1812_v22, %v3013_v17  ;;  %v2274_v22 = vld [vmem:[%s3259_s20] ss:$0 sm:$0xff] }
 0x50e   : > { %v1818_v41 = vsel %vm781_vm0, %v3121_v0, 0.0 }
 0x50f   : > { %1819 = vadd.xlane.f32.xlu1 %v1818_v41 }
 0x594   : > { %v1817_v23 = vpop.xlane.xlu0 %1816 }
 0x595   : > { %v1821_v24 = vmul.f32 0.03125, %v1817_v23 }
 0x597   : > { %v1823_v25 = vsub.f32 %v3116_v19, %v1821_v24 }
 0x598   : > { %v1820_v26 = vpop.xlane.xlu1 %1819 }
 0x599   : > { %v1822_v12 = vmul.f32 0.03125, %v1820_v26  ;;  %v1825_v1 = vmul.f32 %v1823_v25, %v1823_v25 }
 0x59b   : > { %v1824_v27 = vsub.f32 %v3121_v0, %v1822_v12  ;;  %v1827_v28 = vsel %vm781_vm0, %v1825_v1, 0.0 }
 0x59c   : > { %1828 = vadd.xlane.f32.xlu0 %v1827_v28 }
 0x59d   : > { %v1826_v29 = vmul.f32 %v1824_v27, %v1824_v27 }
 0x59f   : > { %v1830_v17 = vsel %vm781_vm0, %v1826_v29, 0.0 }
 0x5a0   : > { %1831 = vadd.xlane.f32.xlu1 %v1830_v17 }
 0x625   : > { %v1829_v32 = vpop.xlane.xlu0 %1828 }
 0x626   : > { %v1833_v33 = vmul.f32 0.03125, %v1829_v32 }
 0x628   : > { %v1835_v35 = vadd.f32 1e-05, %v1833_v33 }
 0x629   : > { %v1832_v36 = vpop.xlane.xlu1 %1831 }
 0x62a   : > { %2481 = vrsqrt.f32 %v1835_v35  ;;  %v1834_v37 = vmul.f32 0.03125, %v1832_v36 }
 0x62c   : > { %v1836_v38 = vadd.f32 1e-05, %v1834_v37 }
 0x62e   : > { %2483 = vrsqrt.f32 %v1836_v38 }
 0x637   : > { %v2482_v39 = vpop.eup %2481 }
 0x638   : > { %v1839_v40 = vmul.f32 %v2482_v39, %v1823_v25  ;;  %v2448_v39 = vld [vmem:[%s3262_s23] sm:$0xff]  }
 0x63a   : > { %v1848_v44 = vmul.f32 %v2268_v42, %v1839_v40 }
 0x63b   : > { %v2484_v34 = vpop.eup %2483 }
 0x63c   : > { %v1840_v43 = vmul.f32 %v2484_v34, %v1824_v27  ;;  %v1857_v47 = vadd.f32 %v2269_v45, %v1848_v44 }
 0x63e   : > { %v1849_v46 = vmul.f32 %v2268_v42, %v1840_v43 }
 0x640   : > { %v1858_v48 = vadd.f32 %v2269_v45, %v1849_v46 }
 0x642   : > { %v1859_v49 = vpack.c.bf16 %v1858_v48, %v1857_v47  ;;  %v2280_v48 = vld [vmem:[%s3260_s21] ss:$0 sm:$0xff] }
 0x644   : > { %2353 = vmatmul.mubr.msk.bf16.vlgmr.msra.gmra.mxu0 %vm781_vm0, %v1859_v49 }
 0x645   : > { %2372 = vmatprep.mubr.msk.bf16.mxu0 %vm2589_vm1, %v2588_v16 }
 0x704   : > { %v1920_v55 = vpop.f32.mrf.mxu0 }
 0x705   : > { %v1921_v56 = vadd.f32 %v2270_v54, %v1920_v55 }
 0x706   : > { %v2354_v57 = vpop.f32.mrf.mxu0 }
 0x707   : > { %v1927_v58 = vmul.f32 %v1921_v56, %v1921_v56 }
 0x708   : > { %v1923_v59 = vpop.f32.mrf.mxu0 }
 0x709   : > { %v1929_v60 = vmul.f32 %v1927_v58, %v1921_v56  ;;  %v1924_v61 = vadd.f32 %v2270_v54, %v1923_v59 }
 0x70a   : > { %v2355_v62 = vpop.f32.mrf.mxu0 }
 0x70b   : > { %v1931_v63 = vmul.f32 0.044715, %v1929_v60  ;;  %v1928_v2 = vmul.f32 %v1924_v61, %v1924_v61 }
 0x70d   : > { %v1933_v3 = vadd.f32 %v1931_v63, %v1921_v56  ;;  %v1930_v4 = vmul.f32 %v1928_v2, %v1924_v61 }
 0x70f   : > { %v1935_v5 = vmul.f32 0.7978846, %v1933_v3  ;;  %v1932_v6 = vmul.f32 0.044715, %v1930_v4 }
 0x711   : > { %2485 = vtanh.f32 %v1935_v5  ;;  %v1934_v7 = vadd.f32 %v1932_v6, %v1924_v61 }
 0x713   : > { %v1936_v8 = vmul.f32 0.7978846, %v1934_v7 }
 0x715   : > { %2487 = vtanh.f32 %v1936_v8 }
 0x71e   : > { %v2486_v9 = vpop.eup %2485 }
 0x71f   : > { %v1939_v10 = vadd.f32 1.0, %v2486_v9 }
 0x721   : > { %v1941_v13 = vmul.f32 0.5, %v1939_v10 }
 0x722   : > { %v2488_v11 = vpop.eup %2487 }
 0x723   : > { %v1940_v14 = vadd.f32 1.0, %v2488_v11  ;;  %v1943_v18 = vmul.f32 %v1941_v13, %v1921_v56  ;;  %v2282_v56 = vld [vmem:[%s3263_s24] ss:$0 sm:$0xff] }
 0x725   : > { %v1942_v15 = vmul.f32 0.5, %v1940_v14 }
 0x727   : > { %v1944_v20 = vmul.f32 %v1942_v15, %v1924_v61 }
 0x729   : > { %v1945_v21 = vpack.c.bf16 %v1944_v20, %v1943_v18 }
 0x72b   : > { %2365 = vmatmul.mubr.msk.bf16.vlgmr.msra.gmra.mxu1 %vm1985_vm2, %v1945_v21 }
 0x7eb   : > { %v2023_v41 = vpop.f32.mrf.mxu1 }
 0x7ec   : > { %v2024_v23 = vadd.f32 %v2274_v22, %v2023_v41 }
 0x7ed   : > { %v2366_v24 = vpop.f32.mrf.mxu1 }
 0x7ee   : > { %v2030_v25 = vadd.f32 %v2024_v23, %v3116_v19 }
 0x7ef   : > { %v2026_v26 = vpop.f32.mrf.mxu1 }
 0x7f0   : > { %v2027_v12 = vadd.f32 %v2274_v22, %v2026_v26  ;;  %v2032_v1 = vsel %vm781_vm0, %v2030_v25, 0.0 }
 0x7f1   : > { %2033 = vadd.xlane.f32.xlu0 %v2032_v1  ;;  %v2367_v27 = vpop.f32.mrf.mxu1 }
 0x7f2   : > { %v2031_v28 = vadd.f32 %v2027_v12, %v3121_v0  ;;  %v2447_v0 = vld [vmem:[%s3262_s23 + $0x8] sm:$0xff]  }
 0x7f3   : > { %2369 = vmatpush3.bf16.msra.mxu0 %v2447_v0 }
 0x7f4   : > { %v2035_v29 = vsel %vm781_vm0, %v2031_v28, 0.0  ;;  %2370 = vmatprep.subr.bf16.mxu0 %v2588_v16  ;;  %v2281_v16 = vld [vmem:[%s3261_s22] ss:$0 sm:$0xff] }
 0x7f5   : > { %2036 = vadd.xlane.f32.xlu1 %v2035_v29 }
 0x7f7   : > { %2371 = vmatpush3.bf16.msra.mxu0 %v2448_v39 }
 0x87a   : > { %v2034_v17 = vpop.xlane.xlu0 %2033 }
 0x87b   : > { %v2038_v30 = vmul.f32 0.03125, %v2034_v17 }
 0x87d   : > { %v2040_v31 = vsub.f32 %v2030_v25, %v2038_v30 }
 0x87e   : > { %v2037_v32 = vpop.xlane.xlu1 %2036 }
 0x87f   : > { %v2039_v33 = vmul.f32 0.03125, %v2037_v32  ;;  %v2042_v35 = vmul.f32 %v2040_v31, %v2040_v31 }
 0x881   : > { %v2041_v36 = vsub.f32 %v2031_v28, %v2039_v33  ;;  %v2044_v19 = vsel %vm781_vm0, %v2042_v35, 0.0 }
 0x882   : > { %2045 = vadd.xlane.f32.xlu0 %v2044_v19 }
 0x883   : > { %v2043_v37 = vmul.f32 %v2041_v36, %v2041_v36 }
 0x885   : > { %v2047_v38 = vsel %vm781_vm0, %v2043_v37, 0.0 }
 0x886   : > { %2048 = vadd.xlane.f32.xlu1 %v2047_v38 }
 0x90b   : > { %v2046_v40 = vpop.xlane.xlu0 %2045 }
 0x90c   : > { %v2050_v42 = vmul.f32 0.03125, %v2046_v40 }
 0x90e   : > { %v2052_v34 = vadd.f32 1e-05, %v2050_v42 }
 0x90f   : > { %v2049_v43 = vpop.xlane.xlu1 %2048 }
 0x910   : > { %2489 = vrsqrt.f32 %v2052_v34  ;;  %v2051_v44 = vmul.f32 0.03125, %v2049_v43 }
 0x912   : > { %v2053_v45 = vadd.f32 1e-05, %v2051_v44 }
 0x914   : > { %2491 = vrsqrt.f32 %v2053_v45 }
 0x91d   : > { %v2490_v46 = vpop.eup %2489 }
 0x91e   : > { %v2056_v47 = vmul.f32 %v2490_v46, %v2040_v31 }
 0x920   : > { %v2065_v51 = vmul.f32 %v2280_v48, %v2056_v47 }
 0x921   : > { %v2492_v49 = vpop.eup %2491 }
 0x922   : > { %v2057_v50 = vmul.f32 %v2492_v49, %v2041_v36  ;;  %v2074_v53 = vadd.f32 %v2281_v16, %v2065_v51 }
 0x924   : > { %v2066_v52 = vmul.f32 %v2280_v48, %v2057_v50 }
 0x926   : > { %v2075_v54 = vadd.f32 %v2281_v16, %v2066_v52 }
 0x928   : > { %v2076_v55 = vpack.c.bf16 %v2075_v54, %v2074_v53 }
 0x92a   : > { %2373 = vmatmul.mubr.msk.bf16.vlgmr.msra.gmra.mxu0 %vm781_vm0, %v2076_v55 }
 0x9ea   : > { %v2137_v57 = vpop.f32.mrf.mxu0 }
 0x9eb   : > { %v2138_v58 = vadd.f32 %v2282_v56, %v2137_v57 }
 0x9ec   : > { %v2374_v59 = vpop.f32.mrf.mxu0 }
 0x9ed   : > { %2145 = vst.msk [vmem:[%s772_s3] sm:$0xff] %vm2144_vm3, %v2138_v58 }
 0x9ee   : > { %v2140_v60 = vpop.f32.mrf.mxu0 }
 0x9ef   : > { %v2141_v61 = vadd.f32 %v2282_v56, %v2140_v60 }
 0x9f0   : > { %v2375_v62 = vpop.f32.mrf.mxu0 }
 0x9f1   : > { %2146 = vst.msk [vmem:[%s772_s3 + $0x8] sm:$0xff] %vm2144_vm3, %v2141_v61 }
 0x9f2   : > { %2532 = shalt.err (!%p2529_p0)
}
 0x9f3   : > { %s2533_s28 = scalar_lea.hbm %s3197_s1, 256  ;;  %s2537_s30 = scalar_lea.hbm %s3264_s25, 512 }
 0x9f4   : > { %p2534_p1 = scmp.ne.s32.totalorder %s3197_s1, %s2533_s28  ;;  %p2538_p4 = scmp.lt.s32.totalorder %s3197_s1, %s3264_s25 }
 0x9f5   : > { %p2539_p7 = scmp.lt.s32.totalorder %s2537_s30, %s2533_s28 }
 0x9f6   : > { %p2535_p2 = pnand %p2534_p1, %p2762_p5 }
 0x9f7   : > { %p2540_p8 = por %p2539_p7, %p2538_p4 }
 0x9f8   : > { %p2536_p3 = pneg %p2535_p2 }
 0x9fa   : > { %p2541_p6 = pnand %p2540_p8, %p2536_p3 }
 0x9fc   : > { %2544 = shalt.err (!%p2541_p6)
}
 0x9fd   : > { %s2592_s9 = smov 128   ;;  %s2593_s8 = smov 8  }
 0x9fe   : > { %2380 = dma.vmem_to_hbm [thread:$0]  (%p2762_p5), %s3192_s29, 256, %s3197_s1, %s3199_s5, %s2592_s9, %s2592_s9, %s2593_s8  }
 0x9ff PF: > { %s3308_s0 = sld [smem:[#allocation10_spill]] }
 0xa00   : > { %s3309_s3 = sld [smem:[#allocation8_spill]] }
 0xa01   : > { %s3310_s6 = sld [smem:[#allocation13_spill]] }
 0xa05   : > { %p2392_p9 = scmp.ge.s32.totalorder %s3308_s0, 2 }
 0xa06   : > { %s2176_s10 = sand.u32 1, %s3309_s3  }
 0xa07   : > { %p3311_p10 = scmp.ne.s32.totalorder %s3310_s6, 0  ;;  %s2177_s28 = scalar_lea.sflag [#allocation4], %s2176_s10 }
 0xa09   : > { %p2387_p11 = pnand %p2392_p9, %p3311_p10 }
 0xa0b   : > { %p2388_p12 = pneg %p2387_p11 }
 0xa0d   : > { %2566 = dma.done.wait (%p2388_p12), %s2177_s28, 256  }
 0xa0e   : > { %2568 = vsyncadd (%p2388_p12), %s2177_s28, 4294967040  ;;  %s3312_s30 = sld [smem:[#allocation11_spill]]  ;;  %s3315_s29 = smov %s2575_s2 }
 0xa0f   : > { %s3313_s27 = sld [smem:[#allocation9_spill]] }
 0xa10   : > { %s3314_s6 = sld [smem:[#allocation12_spill]] }
 0xa14   : > { %p36_p13 = scmp.ge.s32.totalorder %s3312_s30, 4  }
 0xa15   : > { %s3316_s2 = smov %s3313_s27 }
 0xa16   :  { %38 = sbr.rel (!%p36_p13) target bundleno = 16 (0x10), region = 160 }
 0xa1b   :  { %2182 = vsyncpa [#allocation3], 1 }
 0xa1c   :  { %2184 = vsyncpa [#allocation3 + $0x1], 1 }
 0xa1d   :  { %2185 = vsyncpa [#allocation4], 1 }
 0xa1e   :  { %2187 = vsyncpa [#allocation4 + $0x1], 1 }

</bundles_post_ra>
